<compile_context>
chip_gen: v7x
topology: tpu7x:2x2x1
jax: 0.10.0
libtpu: 0.0.40
codegen_flags: <defaults>
</compile_context>

<pallas_src>
import math

import numpy as np
import jax
import jax.numpy as jnp
from jax import lax
from jax.experimental import pallas as pl
from jax.experimental.pallas import tpu as pltpu  # noqa: F401  (TPU backend)

# ----------------------- small, module-consistent sizes -----------------------
B = 2              # batch
C_IN = 4           # in_channels
C_OUT = 8          # out_channels (embed dim of the skip-fusion attention)
C_SKIP = 6         # skip_channels
STATIC_DIM = 5     # static_dim (FiLM input; FiLM itself is TODO, see above)
L = 16             # sequence_length fed to the block
UF = 2             # upsample_factor
K_UP = UF * 2      # ConvTranspose1d kernel_size = 4
T = L * UF         # upsampled sequence length = 32 (< 50 -> no transformer)
N_HEADS = 4        # EnhancedSkipFusion attention_heads
HEAD_DIM = C_OUT // N_HEADS
BL = B * L         # 32  (lanes of the pre-upsample stacked layout)
BT = B * T         # 64  (lanes of the post-upsample stacked layout)
RHT = B * N_HEADS * T   # 256 stacked attention rows (b, h, i)
OUT_W = 128        # lane-padded output width
EPS = 1e-5
NEG = -1e30


def _erf(x):
    # Abramowitz & Stegun 7.1.26 rational approximation (|err| < 1.5e-7).
    a1, a2, a3, a4, a5 = 0.254829592, -0.284496736, 1.421413741, -1.453152027, 1.061405429
    pcoef = 0.3275911
    s = jnp.where(x >= 0.0, 1.0, -1.0)
    z = jnp.abs(x)
    t = pl.reciprocal(1.0 + pcoef * z, approx=False)
    poly = ((((a5 * t + a4) * t + a3) * t + a2) * t + a1) * t
    return s * (1.0 - poly * jnp.exp(-z * z))


def _gelu_exact(x):
    # nn.GELU() default (erf-based, approximate='none')
    return 0.5 * x * (1.0 + _erf(x * (1.0 / math.sqrt(2.0))))


def decoder_block_kernel(x_ref, skip_ref, w_ref, v_ref, a_ref, gb_ref, out_ref):
    f32 = jnp.float32
    x = x_ref[...]        # (C_IN, B*L)   lane = b*L + m
    skip = skip_ref[...]  # (C_SKIP, B*T) lane = b*T + t

    # ---- packed weights: 8-aligned row blocks, lane slices at offset 0 ----
    w_up = w_ref[0:16, 0:12]            # polyphase ConvTranspose weight
    w_kv = w_ref[16:32, 0:C_SKIP]       # fused (skip_align o KV) projection
    w_q = w_ref[32:40, 0:C_OUT]         # Q projection (scale folded)
    w_o = w_ref[40:48, 0:C_OUT]         # attention out-projection
    w_g = w_ref[48:56, 0:2 * C_OUT]     # fusion gate 1x1 conv
    w_3 = w_ref[56:64, 0:6 * C_OUT]     # fused k=3 conv weight
    w_1 = w_ref[64:72, 0:C_OUT]         # final 1x1 conv (GroupNorm affine folded)

    # ---- pre-broadcast bias / affine rows (8-aligned row blocks) ----
    b_up = v_ref[0:8, :]
    b_q = v_ref[8:16, :]
    b_kv = v_ref[16:32, :]
    b_o = v_ref[32:40, :]
    b_g = v_ref[40:48, :]
    b_3 = v_ref[48:56, :]
    b_1 = v_ref[56:64, :]
    ln_w = v_ref[64:72, :]
    ln_b = v_ref[72:80, :]

    # ---- structural constants (pack-time; no per-call iota rebuilds) ----
    s_even = v_ref[80:112, :]           # (BL, BT) even-phase interleave scatter
    s_odd = v_ref[112:144, :]           # (BL, BT) odd-phase interleave scatter
    m_prev_t = v_ref[144:145, :]        # shift-prev boundary mask, period T
    m_next_t = v_ref[145:146, :]        # shift-next boundary mask, period T
    m_prev_l = v_ref[146:147, 0:BL]     # shift-prev boundary mask, period L
    m_next_l = v_ref[147:148, 0:BL]     # shift-next boundary mask, period L
    seg_t = v_ref[152:154, :]           # (B, BT) one-hot batch segments
    r2 = v_ref[160:162, 0:2 * C_OUT]    # (2, 16) channel-sum / channel-sumsq rows

    gq = a_ref[0:RHT, :]                # (256, 64) query row-gather
    negm = a_ref[RHT:2 * RHT, :]        # (256, 64) additive cross-batch -inf mask
    mhead = a_ref[2 * RHT:3 * RHT, 0:C_OUT]  # (256, 8) per-row head channel mask
    gback = gb_ref[...]                 # (64, 256) head re-gather

    def shift_prev(a, mask):
        z = jnp.zeros((a.shape[0], 1), f32)
        return jnp.concatenate([z, a[:, :-1]], axis=1) * mask

    def shift_next(a, mask):
        z = jnp.zeros((a.shape[0], 1), f32)
        return jnp.concatenate([a[:, 1:], z], axis=1) * mask

    # TODO(synk): EnhancedS4Layer residual stack not defined in the provided source.

    # --- ConvTranspose1d(C_IN->C_OUT, k=4, stride=2, pad=1) as polyphase conv ---
    x3 = jnp.concatenate(
        [x, shift_prev(x, m_prev_l), shift_next(x, m_next_l)], axis=0)   # (3*C_IN, BL)
    phases = jnp.dot(w_up, x3, preferred_element_type=f32)               # (2*C_OUT, BL)
    main = (jnp.dot(phases[0:C_OUT], s_even, preferred_element_type=f32)
            + jnp.dot(phases[C_OUT:], s_odd, preferred_element_type=f32)
            + b_up)                                                      # (C_OUT, BT)

    # ----------------------------- EnhancedSkipFusion -----------------------------
    # MultiheadAttention(query=main, key=value=skip_align(skip)), eval (no dropout).
    q = jnp.dot(w_q, main, preferred_element_type=f32) + b_q             # (8, 64)
    kv = jnp.dot(w_kv, skip, preferred_element_type=f32) + b_kv          # (16, 64)
    k = kv[0:C_OUT]
    v = kv[C_OUT:]

    # stacked rows: row = (b*H + h)*T + i
    qh = lax.dot_general(gq, q, (((1,), (1,)), ((), ())),
                         preferred_element_type=f32) * mhead             # (256, 8)
    scores = jnp.dot(qh, k, preferred_element_type=f32) + negm           # (256, 64)
    m = jnp.max(scores, axis=-1, keepdims=True)
    p = jnp.exp(scores - m)
    denom = jnp.sum(p, axis=-1, keepdims=True)
    probs = p * pl.reciprocal(denom, approx=False)
    o = lax.dot_general(probs, v, (((1,), (1,)), ((), ())),
                        preferred_element_type=f32) * mhead              # (256, 8)
    headcat_t = jnp.dot(gback, o, preferred_element_type=f32)            # (64, 8)
    attended = lax.dot_general(w_o, headcat_t, (((1,), (1,)), ((), ())),
                               preferred_element_type=f32) + b_o         # (8, 64)

    # fusion gate: sigmoid(Conv1x1(cat([main, attended], channel-dim)))
    gate = jax.nn.sigmoid(
        jnp.dot(w_g, jnp.concatenate([main, attended], axis=0),
                preferred_element_type=f32) + b_g)
    gated = attended * gate

    # fusion_layers: Conv1d(k=3, pad=1) on cat([main, gated]) -> GELU -> GroupNorm(1)
    #                -> (Dropout: eval identity) -> Conv1x1 (GN affine folded here)
    stack6 = jnp.concatenate(
        [shift_prev(main, m_prev_t), main, shift_next(main, m_next_t),
         shift_prev(gated, m_prev_t), gated, shift_next(gated, m_next_t)],
        axis=0)                                                          # (48, 64)
    h3 = _gelu_exact(jnp.dot(w_3, stack6, preferred_element_type=f32) + b_3)

    # GroupNorm(1, C_OUT): per-sample stats over (C, T) via segmented matmuls
    colstats = jnp.dot(r2, jnp.concatenate([h3, h3 * h3], axis=0),
                       preferred_element_type=f32)                       # (2, 64)
    bstats = lax.dot_general(colstats, seg_t, (((1,), (1,)), ((), ())),
                             preferred_element_type=f32)                 # (2, B)
    inv_n = 1.0 / (C_OUT * T)
    mean_b = bstats[0:1, :] * inv_n
    var_b = bstats[1:2, :] * inv_n - mean_b * mean_b
    rstd_b = lax.rsqrt(var_b + EPS)
    mr_lane = jnp.dot(jnp.concatenate([mean_b, rstd_b], axis=0), seg_t,
                      preferred_element_type=f32)                        # (2, 64)
    h3n = (h3 - mr_lane[0:1, :]) * mr_lane[1:2, :]
    fused = jnp.dot(w_1, h3n, preferred_element_type=f32) + b_1          # (8, 64)

    # upsampled_seq_len = 32 < 50 -> the reference module has no transformer stack.
    # TODO(synk): AdaptiveFiLMWithDropout and EnhancedConvBlock definitions not
    #             provided; their transforms are omitted.

    # final LayerNorm over the channel dimension (stats via one stacked matmul)
    cs = jnp.dot(r2, jnp.concatenate([fused, fused * fused], axis=0),
                 preferred_element_type=f32)                             # (2, 64)
    mu = cs[0:1, :] * (1.0 / C_OUT)
    var = cs[1:2, :] * (1.0 / C_OUT) - mu * mu
    y = (fused - mu) * lax.rsqrt(var + EPS) * ln_w + ln_b

    # lane-dense (128-wide) unmasked store; wrapper slices back to BT.
    out_ref[...] = jnp.concatenate(
        [y, jnp.zeros((C_OUT, OUT_W - BT), f32)], axis=1).astype(out_ref.dtype)


@jax.jit
def optimized_decoder_block(x, skip_connection, static_params, packed):
    """x: (B, C_IN, L), skip_connection: (B, C_SKIP, T), static_params: (B, STATIC_DIM)."""
    del static_params  # TODO(synk): FiLM conditioning requires AdaptiveFiLMWithDropout (not provided)

    # Lane-dense stacked layouts: (C, B*len) with lane = b*len + t (layout plumbing only).
    x_st = jnp.transpose(x, (1, 0, 2)).reshape(C_IN, BL)
    skip_st = jnp.transpose(skip_connection, (1, 0, 2)).reshape(C_SKIP, BT)

    # Single invocation, no grid: the whole working set is a few hundred KiB of VMEM.
    # (Do NOT split across TensorCores at this size: sync cost > work.)
    out = pl.pallas_call(
        decoder_block_kernel,
        out_shape=jax.ShapeDtypeStruct((C_OUT, OUT_W), jnp.float32),
        cost_estimate=pl.CostEstimate(flops=1_400_000, transcendentals=18_000,
                                      bytes_accessed=360_000),
    )(x_st, skip_st, packed["w"], packed["vpack"], packed["apack"], packed["gback"])

    return jnp.transpose(out[:, :BT].reshape(C_OUT, B, T), (1, 0, 2))    # (B, C_OUT, T)


def init_params(key):
    """PyTorch-layout parameters of the implemented sub-path."""
    ks = jax.random.split(key, 18)

    def nrm(k, shape, scale=0.2):
        return scale * jax.random.normal(k, shape, dtype=jnp.float32)

    p = {}
    p["up_w"] = nrm(ks[0], (C_IN, C_OUT, K_UP))          # ConvTranspose1d weight
    p["up_b"] = nrm(ks[1], (C_OUT,), 0.05)
    p["al_w"] = nrm(ks[2], (C_OUT, C_SKIP))              # skip_align Conv1d k=1
    p["al_b"] = nrm(ks[3], (C_OUT,), 0.05)
    p["attn_in_w"] = nrm(ks[4], (3 * C_OUT, C_OUT))      # MHA in_proj (Q;K;V)
    p["attn_in_b"] = nrm(ks[5], (3 * C_OUT,), 0.05)
    p["attn_out_w"] = nrm(ks[6], (C_OUT, C_OUT))         # MHA out_proj
    p["attn_out_b"] = nrm(ks[7], (C_OUT,), 0.05)
    p["gate_w"] = nrm(ks[8], (C_OUT, 2 * C_OUT))         # fusion_gate Conv1d k=1
    p["gate_b"] = nrm(ks[9], (C_OUT,), 0.05)
    p["f3_w"] = nrm(ks[10], (C_OUT, 2 * C_OUT, 3))       # fusion Conv1d k=3
    p["f3_b"] = nrm(ks[11], (C_OUT,), 0.05)
    p["gn_w"] = 1.0 + nrm(ks[12], (C_OUT,), 0.05)        # GroupNorm(1, C_OUT)
    p["gn_b"] = nrm(ks[13], (C_OUT,), 0.05)
    p["f1_w"] = nrm(ks[14], (C_OUT, C_OUT))              # fusion Conv1d k=1
    p["f1_b"] = nrm(ks[15], (C_OUT,), 0.05)
    p["ln_w"] = 1.0 + nrm(ks[16], (C_OUT,), 0.05)        # final LayerNorm
    p["ln_b"] = nrm(ks[17], (C_OUT,), 0.05)
    return p


def pack_params(p):
    """One-time repack: fold skip_align/scale/GN-affine, build aligned row-packed
    weight/bias slabs and all structural selection/mask constants."""
    f32 = np.float32
    npy = lambda a: np.asarray(a, dtype=f32)

    # polyphase ConvTranspose weight on stacked [x_cur; x_prev; x_next]
    up = npy(p["up_w"])                                   # (C_IN, C_OUT, K_UP)
    zc = np.zeros((C_OUT, C_IN), f32)
    w_even = np.concatenate([up[:, :, 1].T, up[:, :, 3].T, zc], axis=1)    # (8, 12)
    w_odd = np.concatenate([up[:, :, 2].T, zc, up[:, :, 0].T], axis=1)     # (8, 12)
    w_up = np.concatenate([w_even, w_odd], axis=0)                         # (16, 12)

    attn_in_w, attn_in_b = npy(p["attn_in_w"]), npy(p["attn_in_b"])
    al_w, al_b = npy(p["al_w"]), npy(p["al_b"])
    scale = 1.0 / math.sqrt(HEAD_DIM)
    w_q = attn_in_w[0:C_OUT] * scale                       # q scale folded
    b_q = attn_in_b[0:C_OUT] * scale
    w_kv_raw = attn_in_w[C_OUT:]                           # (16, 8)
    w_kv = w_kv_raw @ al_w                                 # skip_align folded -> (16, 6)
    b_kv = w_kv_raw @ al_b + attn_in_b[C_OUT:]             # (16,)

    f3 = npy(p["f3_w"])
    w_3 = np.concatenate([f3[:, :C_OUT, 0], f3[:, :C_OUT, 1], f3[:, :C_OUT, 2],
                          f3[:, C_OUT:, 0], f3[:, C_OUT:, 1], f3[:, C_OUT:, 2]],
                         axis=1)                                           # (8, 48)

    gn_w, gn_b = npy(p["gn_w"]), npy(p["gn_b"])
    f1_w, f1_b = npy(p["f1_w"]), npy(p["f1_b"])
    w_1 = f1_w * gn_w[None, :]                             # GroupNorm affine folded
    b_1 = f1_w @ gn_b + f1_b

    # ---- weight slab: 8-aligned row blocks, 128 lanes, offset-0 column slices ----
    W = np.zeros((72, 128), f32)
    W[0:16, 0:12] = w_up
    W[16:32, 0:C_SKIP] = w_kv
    W[32:40, 0:C_OUT] = w_q
    W[40:48, 0:C_OUT] = npy(p["attn_out_w"])
    W[48:56, 0:2 * C_OUT] = npy(p["gate_w"])
    W[56:64, 0:6 * C_OUT] = w_3
    W[64:72, 0:C_OUT] = w_1

    # ---- bias/affine rows (pre-broadcast) + structural constants ----
    V = np.zeros((168, BT), f32)

    def put(row, vec):
        vec = np.asarray(vec, f32).reshape(-1, 1)
        V[row:row + vec.shape[0], :] = np.tile(vec, (1, BT))

    put(0, npy(p["up_b"]))
    put(8, b_q)
    put(16, b_kv)
    put(32, npy(p["attn_out_b"]))
    put(40, npy(p["gate_b"]))
    put(48, npy(p["f3_b"]))
    put(56, b_1)
    put(64, npy(p["ln_w"]))
    put(72, npy(p["ln_b"]))

    rows = np.arange(BL)[:, None]
    col_t = np.arange(BT)
    V[80:112, :] = (col_t[None, :] == 2 * rows).astype(f32)        # s_even
    V[112:144, :] = (col_t[None, :] == 2 * rows + 1).astype(f32)   # s_odd
    V[144, :] = (col_t % T != 0).astype(f32)                       # shift-prev mask (T)
    V[145, :] = (col_t % T != T - 1).astype(f32)                   # shift-next mask (T)
    col_l = np.arange(BL)
    V[146, 0:BL] = (col_l % L != 0).astype(f32)                    # shift-prev mask (L)
    V[147, 0:BL] = (col_l % L != L - 1).astype(f32)                # shift-next mask (L)
    V[152:152 + B, :] = (col_t[None, :] // T == np.arange(B)[:, None]).astype(f32)  # SegT
    V[160, 0:C_OUT] = 1.0                                          # R2 row 0 (sum h)
    V[161, C_OUT:2 * C_OUT] = 1.0                                  # R2 row 1 (sum h^2)

    # ---- attention constants: row = (b*H + h)*T + i ----
    r = np.arange(RHT)
    rb = r // (N_HEADS * T)
    rh = (r // T) % N_HEADS
    ri = r % T
    gq = (col_t[None, :] == (rb * T + ri)[:, None]).astype(f32)                       # (256, 64)
    negm = np.where((col_t[None, :] // T) == rb[:, None], 0.0, NEG).astype(f32)       # (256, 64)
    mhead = np.zeros((RHT, BT), f32)
    mhead[:, 0:C_OUT] = ((np.arange(C_OUT)[None, :] // HEAD_DIM) == rh[:, None]).astype(f32)
    A = np.concatenate([gq, negm, mhead], axis=0)                                     # (768, 64)

    gback = ((rb[None, :] == (col_t[:, None] // T)) &
             (ri[None, :] == (col_t[:, None] % T))).astype(f32)                       # (64, 256)

    return {"w": jnp.asarray(W), "vpack": jnp.asarray(V),
            "apack": jnp.asarray(A), "gback": jnp.asarray(gback)}


if __name__ == "__main__":
    key = jax.random.PRNGKey(0)
    kx, ksk, kst, kp = jax.random.split(key, 4)
    x = jax.random.normal(kx, (B, C_IN, L), dtype=jnp.float32)
    skip_connection = jax.random.normal(ksk, (B, C_SKIP, T), dtype=jnp.float32)
    static_params = jax.random.normal(kst, (B, STATIC_DIM), dtype=jnp.float32)

    params = init_params(kp)
    packed = pack_params(params)   # one-time packing/folding, outside the hot path

    out = optimized_decoder_block(x, skip_connection, static_params, packed)
    out = jax.block_until_ready(out)
    assert out.shape == (B, C_OUT, T) and out.dtype == jnp.float32
    print("KERNEL_OK")
</pallas_src>

<mosaic_0001>
module attributes {stable_mosaic.version = 11 : i64} {
  func.func @decoder_block_kernel(%arg0: memref<4x32xf32, #tpu.memory_space<vmem>>, %arg1: memref<6x64xf32, #tpu.memory_space<vmem>>, %arg2: memref<72x128xf32, #tpu.memory_space<vmem>>, %arg3: memref<168x64xf32, #tpu.memory_space<vmem>>, %arg4: memref<768x64xf32, #tpu.memory_space<vmem>>, %arg5: memref<64x256xf32, #tpu.memory_space<vmem>>, %arg6: memref<8x128xf32, #tpu.memory_space<vmem>>) attributes {dimension_semantics = [], scalar_prefetch = 0 : i64, scratch_operands = 0 : i64, tpu.core_type = #tpu.core_type<tc>} {
    %c0 = arith.constant 0 : index
    %c0_0 = arith.constant 0 : index
    %0 = vector.load %arg0[%c0, %c0_0] : memref<4x32xf32, #tpu.memory_space<vmem>>, vector<4x32xf32>
    %c0_1 = arith.constant 0 : index
    %c0_2 = arith.constant 0 : index
    %1 = vector.load %arg1[%c0_1, %c0_2] : memref<6x64xf32, #tpu.memory_space<vmem>>, vector<6x64xf32>
    %c0_3 = arith.constant 0 : index
    %c0_4 = arith.constant 0 : index
    %2 = vector.load %arg2[%c0_3, %c0_4] : memref<72x128xf32, #tpu.memory_space<vmem>>, vector<16x12xf32>
    %c16 = arith.constant 16 : index
    %c0_5 = arith.constant 0 : index
    %3 = vector.load %arg2[%c16, %c0_5] : memref<72x128xf32, #tpu.memory_space<vmem>>, vector<16x6xf32>
    %c32 = arith.constant 32 : index
    %c0_6 = arith.constant 0 : index
    %4 = vector.load %arg2[%c32, %c0_6] : memref<72x128xf32, #tpu.memory_space<vmem>>, vector<8x8xf32>
    %c40 = arith.constant 40 : index
    %c0_7 = arith.constant 0 : index
    %5 = vector.load %arg2[%c40, %c0_7] : memref<72x128xf32, #tpu.memory_space<vmem>>, vector<8x8xf32>
    %c48 = arith.constant 48 : index
    %c0_8 = arith.constant 0 : index
    %6 = vector.load %arg2[%c48, %c0_8] : memref<72x128xf32, #tpu.memory_space<vmem>>, vector<8x16xf32>
    %c56 = arith.constant 56 : index
    %c0_9 = arith.constant 0 : index
    %7 = vector.load %arg2[%c56, %c0_9] : memref<72x128xf32, #tpu.memory_space<vmem>>, vector<8x48xf32>
    %c64 = arith.constant 64 : index
    %c0_10 = arith.constant 0 : index
    %8 = vector.load %arg2[%c64, %c0_10] : memref<72x128xf32, #tpu.memory_space<vmem>>, vector<8x8xf32>
    %c0_11 = arith.constant 0 : index
    %c0_12 = arith.constant 0 : index
    %9 = vector.load %arg3[%c0_11, %c0_12] : memref<168x64xf32, #tpu.memory_space<vmem>>, vector<8x64xf32>
    %c8 = arith.constant 8 : index
    %c0_13 = arith.constant 0 : index
    %10 = vector.load %arg3[%c8, %c0_13] : memref<168x64xf32, #tpu.memory_space<vmem>>, vector<8x64xf32>
    %c16_14 = arith.constant 16 : index
    %c0_15 = arith.constant 0 : index
    %11 = vector.load %arg3[%c16_14, %c0_15] : memref<168x64xf32, #tpu.memory_space<vmem>>, vector<16x64xf32>
    %c32_16 = arith.constant 32 : index
    %c0_17 = arith.constant 0 : index
    %12 = vector.load %arg3[%c32_16, %c0_17] : memref<168x64xf32, #tpu.memory_space<vmem>>, vector<8x64xf32>
    %c40_18 = arith.constant 40 : index
    %c0_19 = arith.constant 0 : index
    %13 = vector.load %arg3[%c40_18, %c0_19] : memref<168x64xf32, #tpu.memory_space<vmem>>, vector<8x64xf32>
    %c48_20 = arith.constant 48 : index
    %c0_21 = arith.constant 0 : index
    %14 = vector.load %arg3[%c48_20, %c0_21] : memref<168x64xf32, #tpu.memory_space<vmem>>, vector<8x64xf32>
    %c56_22 = arith.constant 56 : index
    %c0_23 = arith.constant 0 : index
    %15 = vector.load %arg3[%c56_22, %c0_23] : memref<168x64xf32, #tpu.memory_space<vmem>>, vector<8x64xf32>
    %c64_24 = arith.constant 64 : index
    %c0_25 = arith.constant 0 : index
    %16 = vector.load %arg3[%c64_24, %c0_25] : memref<168x64xf32, #tpu.memory_space<vmem>>, vector<8x64xf32>
    %c72 = arith.constant 72 : index
    %c0_26 = arith.constant 0 : index
    %17 = vector.load %arg3[%c72, %c0_26] : memref<168x64xf32, #tpu.memory_space<vmem>>, vector<8x64xf32>
    %c80 = arith.constant 80 : index
    %c0_27 = arith.constant 0 : index
    %18 = vector.load %arg3[%c80, %c0_27] : memref<168x64xf32, #tpu.memory_space<vmem>>, vector<32x64xf32>
    %c112 = arith.constant 112 : index
    %c0_28 = arith.constant 0 : index
    %19 = vector.load %arg3[%c112, %c0_28] : memref<168x64xf32, #tpu.memory_space<vmem>>, vector<32x64xf32>
    %c144 = arith.constant 144 : index
    %c0_29 = arith.constant 0 : index
    %20 = vector.load %arg3[%c144, %c0_29] : memref<168x64xf32, #tpu.memory_space<vmem>>, vector<1x64xf32>
    %c145 = arith.constant 145 : index
    %c0_30 = arith.constant 0 : index
    %21 = vector.load %arg3[%c145, %c0_30] : memref<168x64xf32, #tpu.memory_space<vmem>>, vector<1x64xf32>
    %c146 = arith.constant 146 : index
    %c0_31 = arith.constant 0 : index
    %22 = vector.load %arg3[%c146, %c0_31] : memref<168x64xf32, #tpu.memory_space<vmem>>, vector<1x32xf32>
    %c147 = arith.constant 147 : index
    %c0_32 = arith.constant 0 : index
    %23 = vector.load %arg3[%c147, %c0_32] : memref<168x64xf32, #tpu.memory_space<vmem>>, vector<1x32xf32>
    %c152 = arith.constant 152 : index
    %c0_33 = arith.constant 0 : index
    %24 = vector.load %arg3[%c152, %c0_33] : memref<168x64xf32, #tpu.memory_space<vmem>>, vector<2x64xf32>
    %c160 = arith.constant 160 : index
    %c0_34 = arith.constant 0 : index
    %25 = vector.load %arg3[%c160, %c0_34] : memref<168x64xf32, #tpu.memory_space<vmem>>, vector<2x16xf32>
    %c0_35 = arith.constant 0 : index
    %c0_36 = arith.constant 0 : index
    %26 = vector.load %arg4[%c0_35, %c0_36] : memref<768x64xf32, #tpu.memory_space<vmem>>, vector<256x64xf32>
    %c256 = arith.constant 256 : index
    %c0_37 = arith.constant 0 : index
    %27 = vector.load %arg4[%c256, %c0_37] : memref<768x64xf32, #tpu.memory_space<vmem>>, vector<256x64xf32>
    %c512 = arith.constant 512 : index
    %c0_38 = arith.constant 0 : index
    %28 = vector.load %arg4[%c512, %c0_38] : memref<768x64xf32, #tpu.memory_space<vmem>>, vector<256x8xf32>
    %c0_39 = arith.constant 0 : index
    %c0_40 = arith.constant 0 : index
    %29 = vector.load %arg5[%c0_39, %c0_40] : memref<64x256xf32, #tpu.memory_space<vmem>>, vector<64x256xf32>
    %cst = arith.constant 0.000000e+00 : f32
    %30 = vector.broadcast %cst : f32 to vector<4x1xf32>
    %31 = vector.extract_strided_slice %0 {offsets = [0, 0], sizes = [4, 31], strides = [1, 1]} : vector<4x32xf32> to vector<4x31xf32>
    %32 = tpu.concatenate %30, %31 in 1 : vector<4x1xf32>, vector<4x31xf32> -> vector<4x32xf32>
    %33 = vector.broadcast %22 : vector<1x32xf32> to vector<4x32xf32>
    %34 = arith.mulf %32, %33 : vector<4x32xf32>
    %cst_41 = arith.constant 0.000000e+00 : f32
    %35 = vector.broadcast %cst_41 : f32 to vector<4x1xf32>
    %36 = vector.extract_strided_slice %0 {offsets = [0, 1], sizes = [4, 31], strides = [1, 1]} : vector<4x32xf32> to vector<4x31xf32>
    %37 = tpu.concatenate %36, %35 in 1 : vector<4x31xf32>, vector<4x1xf32> -> vector<4x32xf32>
    %38 = vector.broadcast %23 : vector<1x32xf32> to vector<4x32xf32>
    %39 = arith.mulf %37, %38 : vector<4x32xf32>
    %40 = tpu.concatenate %0, %34, %39 in 0 : vector<4x32xf32>, vector<4x32xf32>, vector<4x32xf32> -> vector<12x32xf32>
    %cst_42 = arith.constant dense<0.000000e+00> : vector<16x32xf32>
    %41 = tpu.matmul %2, %40, %cst_42 {dimension_numbers = #tpu.dot_dimension_numbers<[1], [0], [0], [1], [0, 0, 1, 1], [], []>} : vector<16x12xf32>, vector<12x32xf32>, vector<16x32xf32> -> vector<16x32xf32>
    %42 = vector.extract_strided_slice %41 {offsets = [0, 0], sizes = [8, 32], strides = [1, 1]} : vector<16x32xf32> to vector<8x32xf32>
    %cst_43 = arith.constant dense<0.000000e+00> : vector<8x64xf32>
    %43 = tpu.matmul %42, %18, %cst_43 {dimension_numbers = #tpu.dot_dimension_numbers<[1], [0], [0], [1], [0, 0, 1, 1], [], []>} : vector<8x32xf32>, vector<32x64xf32>, vector<8x64xf32> -> vector<8x64xf32>
    %44 = vector.extract_strided_slice %41 {offsets = [8, 0], sizes = [8, 32], strides = [1, 1]} : vector<16x32xf32> to vector<8x32xf32>
    %cst_44 = arith.constant dense<0.000000e+00> : vector<8x64xf32>
    %45 = tpu.matmul %44, %19, %cst_44 {dimension_numbers = #tpu.dot_dimension_numbers<[1], [0], [0], [1], [0, 0, 1, 1], [], []>} : vector<8x32xf32>, vector<32x64xf32>, vector<8x64xf32> -> vector<8x64xf32>
    %46 = arith.addf %43, %45 : vector<8x64xf32>
    %47 = arith.addf %46, %9 : vector<8x64xf32>
    %cst_45 = arith.constant dense<0.000000e+00> : vector<8x64xf32>
    %48 = tpu.matmul %4, %47, %cst_45 {dimension_numbers = #tpu.dot_dimension_numbers<[1], [0], [0], [1], [0, 0, 1, 1], [], []>} : vector<8x8xf32>, vector<8x64xf32>, vector<8x64xf32> -> vector<8x64xf32>
    %49 = arith.addf %48, %10 : vector<8x64xf32>
    %cst_46 = arith.constant dense<0.000000e+00> : vector<16x64xf32>
    %50 = tpu.matmul %3, %1, %cst_46 {dimension_numbers = #tpu.dot_dimension_numbers<[1], [0], [0], [1], [0, 0, 1, 1], [], []>} : vector<16x6xf32>, vector<6x64xf32>, vector<16x64xf32> -> vector<16x64xf32>
    %51 = arith.addf %50, %11 : vector<16x64xf32>
    %52 = vector.extract_strided_slice %51 {offsets = [0, 0], sizes = [8, 64], strides = [1, 1]} : vector<16x64xf32> to vector<8x64xf32>
    %53 = vector.extract_strided_slice %51 {offsets = [8, 0], sizes = [8, 64], strides = [1, 1]} : vector<16x64xf32> to vector<8x64xf32>
    %cst_47 = arith.constant dense<0.000000e+00> : vector<256x8xf32>
    %54 = tpu.matmul %26, %49, %cst_47 {dimension_numbers = #tpu.dot_dimension_numbers<[1], [1], [0], [0], [0, 0, 1, 0], [], []>} : vector<256x64xf32>, vector<8x64xf32>, vector<256x8xf32> -> vector<256x8xf32>
    %55 = arith.mulf %54, %28 : vector<256x8xf32>
    %cst_48 = arith.constant dense<0.000000e+00> : vector<256x64xf32>
    %56 = tpu.matmul %55, %52, %cst_48 {dimension_numbers = #tpu.dot_dimension_numbers<[1], [0], [0], [1], [0, 0, 1, 1], [], []>} : vector<256x8xf32>, vector<8x64xf32>, vector<256x64xf32> -> vector<256x64xf32>
    %57 = arith.addf %56, %27 : vector<256x64xf32>
    %cst_49 = arith.constant dense<0xFF800000> : vector<256xf32>
    %58 = vector.multi_reduction <maximumf>, %57, %cst_49 [1] : vector<256x64xf32> to vector<256xf32>
    %59 = vector.shape_cast %58 : vector<256xf32> to vector<256x1xf32>
    %60 = vector.broadcast %59 : vector<256x1xf32> to vector<256x64xf32>
    %61 = arith.subf %57, %60 : vector<256x64xf32>
    %62 = math.exp %61 : vector<256x64xf32>
    %cst_50 = arith.constant dense<0.000000e+00> : vector<256xf32>
    %63 = vector.multi_reduction <add>, %62, %cst_50 [1] : vector<256x64xf32> to vector<256xf32>
    %64 = vector.shape_cast %63 : vector<256xf32> to vector<256x1xf32>
    %65 = tpu.reciprocal %64 : vector<256x1xf32> -> vector<256x1xf32>
    %66 = vector.broadcast %65 : vector<256x1xf32> to vector<256x64xf32>
    %67 = arith.mulf %62, %66 : vector<256x64xf32>
    %cst_51 = arith.constant dense<0.000000e+00> : vector<256x8xf32>
    %68 = tpu.matmul %67, %53, %cst_51 {dimension_numbers = #tpu.dot_dimension_numbers<[1], [1], [0], [0], [0, 0, 1, 0], [], []>} : vector<256x64xf32>, vector<8x64xf32>, vector<256x8xf32> -> vector<256x8xf32>
    %69 = arith.mulf %68, %28 : vector<256x8xf32>
    %cst_52 = arith.constant dense<0.000000e+00> : vector<64x8xf32>
    %70 = tpu.matmul %29, %69, %cst_52 {dimension_numbers = #tpu.dot_dimension_numbers<[1], [0], [0], [1], [0, 0, 1, 1], [], []>} : vector<64x256xf32>, vector<256x8xf32>, vector<64x8xf32> -> vector<64x8xf32>
    %cst_53 = arith.constant dense<0.000000e+00> : vector<8x64xf32>
    %71 = tpu.matmul %5, %70, %cst_53 {dimension_numbers = #tpu.dot_dimension_numbers<[1], [1], [0], [0], [0, 0, 1, 0], [], []>} : vector<8x8xf32>, vector<64x8xf32>, vector<8x64xf32> -> vector<8x64xf32>
    %72 = arith.addf %71, %12 : vector<8x64xf32>
    %73 = tpu.concatenate %47, %72 in 0 : vector<8x64xf32>, vector<8x64xf32> -> vector<16x64xf32>
    %cst_54 = arith.constant dense<0.000000e+00> : vector<8x64xf32>
    %74 = tpu.matmul %6, %73, %cst_54 {dimension_numbers = #tpu.dot_dimension_numbers<[1], [0], [0], [1], [0, 0, 1, 1], [], []>} : vector<8x16xf32>, vector<16x64xf32>, vector<8x64xf32> -> vector<8x64xf32>
    %75 = arith.addf %74, %13 : vector<8x64xf32>
    %76 = arith.negf %75 : vector<8x64xf32>
    %77 = math.exp %76 : vector<8x64xf32>
    %cst_55 = arith.constant 1.000000e+00 : f32
    %78 = vector.broadcast %cst_55 : f32 to vector<8x64xf32>
    %79 = arith.addf %78, %77 : vector<8x64xf32>
    %80 = arith.divf %78, %79 : vector<8x64xf32>
    %81 = arith.mulf %72, %80 : vector<8x64xf32>
    %cst_56 = arith.constant 0.000000e+00 : f32
    %82 = vector.broadcast %cst_56 : f32 to vector<8x1xf32>
    %83 = vector.extract_strided_slice %47 {offsets = [0, 0], sizes = [8, 63], strides = [1, 1]} : vector<8x64xf32> to vector<8x63xf32>
    %84 = tpu.concatenate %82, %83 in 1 : vector<8x1xf32>, vector<8x63xf32> -> vector<8x64xf32>
    %85 = vector.broadcast %20 : vector<1x64xf32> to vector<8x64xf32>
    %86 = arith.mulf %84, %85 : vector<8x64xf32>
    %cst_57 = arith.constant 0.000000e+00 : f32
    %87 = vector.broadcast %cst_57 : f32 to vector<8x1xf32>
    %88 = vector.extract_strided_slice %47 {offsets = [0, 1], sizes = [8, 63], strides = [1, 1]} : vector<8x64xf32> to vector<8x63xf32>
    %89 = tpu.concatenate %88, %87 in 1 : vector<8x63xf32>, vector<8x1xf32> -> vector<8x64xf32>
    %90 = vector.broadcast %21 : vector<1x64xf32> to vector<8x64xf32>
    %91 = arith.mulf %89, %90 : vector<8x64xf32>
    %cst_58 = arith.constant 0.000000e+00 : f32
    %92 = vector.broadcast %cst_58 : f32 to vector<8x1xf32>
    %93 = vector.extract_strided_slice %81 {offsets = [0, 0], sizes = [8, 63], strides = [1, 1]} : vector<8x64xf32> to vector<8x63xf32>
    %94 = tpu.concatenate %92, %93 in 1 : vector<8x1xf32>, vector<8x63xf32> -> vector<8x64xf32>
    %95 = vector.broadcast %20 : vector<1x64xf32> to vector<8x64xf32>
    %96 = arith.mulf %94, %95 : vector<8x64xf32>
    %cst_59 = arith.constant 0.000000e+00 : f32
    %97 = vector.broadcast %cst_59 : f32 to vector<8x1xf32>
    %98 = vector.extract_strided_slice %81 {offsets = [0, 1], sizes = [8, 63], strides = [1, 1]} : vector<8x64xf32> to vector<8x63xf32>
    %99 = tpu.concatenate %98, %97 in 1 : vector<8x63xf32>, vector<8x1xf32> -> vector<8x64xf32>
    %100 = vector.broadcast %21 : vector<1x64xf32> to vector<8x64xf32>
    %101 = arith.mulf %99, %100 : vector<8x64xf32>
    %102 = tpu.concatenate %86, %47, %91, %96, %81, %101 in 0 : vector<8x64xf32>, vector<8x64xf32>, vector<8x64xf32>, vector<8x64xf32>, vector<8x64xf32>, vector<8x64xf32> -> vector<48x64xf32>
    %cst_60 = arith.constant dense<0.000000e+00> : vector<8x64xf32>
    %103 = tpu.matmul %7, %102, %cst_60 {dimension_numbers = #tpu.dot_dimension_numbers<[1], [0], [0], [1], [0, 0, 1, 1], [], []>} : vector<8x48xf32>, vector<48x64xf32>, vector<8x64xf32> -> vector<8x64xf32>
    %104 = arith.addf %103, %14 : vector<8x64xf32>
    %cst_61 = arith.constant 5.000000e-01 : f32
    %105 = vector.broadcast %cst_61 : f32 to vector<8x64xf32>
    %106 = arith.mulf %105, %104 : vector<8x64xf32>
    %cst_62 = arith.constant 0.707106769 : f32
    %107 = vector.broadcast %cst_62 : f32 to vector<8x64xf32>
    %108 = arith.mulf %104, %107 : vector<8x64xf32>
    %cst_63 = arith.constant 0.000000e+00 : f32
    %109 = vector.broadcast %cst_63 : f32 to vector<8x64xf32>
    %110 = arith.cmpf oge, %108, %109 : vector<8x64xf32>
    %cst_64 = arith.constant 1.000000e+00 : f32
    %cst_65 = arith.constant -1.000000e+00 : f32
    %111 = vector.broadcast %cst_64 : f32 to vector<8x64xf32>
    %112 = vector.broadcast %cst_65 : f32 to vector<8x64xf32>
    %113 = arith.select %110, %111, %112 : vector<8x64xi1>, vector<8x64xf32>
    %114 = math.absf %108 : vector<8x64xf32>
    %cst_66 = arith.constant 0.327591091 : f32
    %115 = vector.broadcast %cst_66 : f32 to vector<8x64xf32>
    %116 = arith.mulf %115, %114 : vector<8x64xf32>
    %cst_67 = arith.constant 1.000000e+00 : f32
    %117 = vector.broadcast %cst_67 : f32 to vector<8x64xf32>
    %118 = arith.addf %117, %116 : vector<8x64xf32>
    %119 = tpu.reciprocal %118 : vector<8x64xf32> -> vector<8x64xf32>
    %cst_68 = arith.constant 1.06140542 : f32
    %120 = vector.broadcast %cst_68 : f32 to vector<8x64xf32>
    %121 = arith.mulf %120, %119 : vector<8x64xf32>
    %cst_69 = arith.constant -1.45315206 : f32
    %122 = vector.broadcast %cst_69 : f32 to vector<8x64xf32>
    %123 = arith.addf %121, %122 : vector<8x64xf32>
    %124 = arith.mulf %123, %119 : vector<8x64xf32>
    %cst_70 = arith.constant 1.42141378 : f32
    %125 = vector.broadcast %cst_70 : f32 to vector<8x64xf32>
    %126 = arith.addf %124, %125 : vector<8x64xf32>
    %127 = arith.mulf %126, %119 : vector<8x64xf32>
    %cst_71 = arith.constant -0.284496725 : f32
    %128 = vector.broadcast %cst_71 : f32 to vector<8x64xf32>
    %129 = arith.addf %127, %128 : vector<8x64xf32>
    %130 = arith.mulf %129, %119 : vector<8x64xf32>
    %cst_72 = arith.constant 0.254829586 : f32
    %131 = vector.broadcast %cst_72 : f32 to vector<8x64xf32>
    %132 = arith.addf %130, %131 : vector<8x64xf32>
    %133 = arith.mulf %132, %119 : vector<8x64xf32>
    %cst_73 = arith.constant 0.000000e+00 : f32
    %134 = vector.broadcast %cst_73 : f32 to vector<8x64xf32>
    %135 = arith.subf %134, %114 : vector<8x64xf32>
    %136 = arith.mulf %135, %114 : vector<8x64xf32>
    %137 = math.exp %136 : vector<8x64xf32>
    %138 = arith.mulf %133, %137 : vector<8x64xf32>
    %cst_74 = arith.constant 1.000000e+00 : f32
    %139 = vector.broadcast %cst_74 : f32 to vector<8x64xf32>
    %140 = arith.subf %139, %138 : vector<8x64xf32>
    %141 = arith.mulf %113, %140 : vector<8x64xf32>
    %cst_75 = arith.constant 1.000000e+00 : f32
    %142 = vector.broadcast %cst_75 : f32 to vector<8x64xf32>
    %143 = arith.addf %142, %141 : vector<8x64xf32>
    %144 = arith.mulf %106, %143 : vector<8x64xf32>
    %145 = arith.mulf %144, %144 : vector<8x64xf32>
    %146 = tpu.concatenate %144, %145 in 0 : vector<8x64xf32>, vector<8x64xf32> -> vector<16x64xf32>
    %cst_76 = arith.constant dense<0.000000e+00> : vector<2x64xf32>
    %147 = tpu.matmul %25, %146, %cst_76 {dimension_numbers = #tpu.dot_dimension_numbers<[1], [0], [0], [1], [0, 0, 1, 1], [], []>} : vector<2x16xf32>, vector<16x64xf32>, vector<2x64xf32> -> vector<2x64xf32>
    %cst_77 = arith.constant dense<0.000000e+00> : vector<2x2xf32>
    %148 = tpu.matmul %147, %24, %cst_77 {dimension_numbers = #tpu.dot_dimension_numbers<[1], [1], [0], [0], [0, 0, 1, 0], [], []>} : vector<2x64xf32>, vector<2x64xf32>, vector<2x2xf32> -> vector<2x2xf32>
    %149 = vector.extract_strided_slice %148 {offsets = [0, 0], sizes = [1, 2], strides = [1, 1]} : vector<2x2xf32> to vector<1x2xf32>
    %cst_78 = arith.constant 3.906250e-03 : f32
    %150 = vector.broadcast %cst_78 : f32 to vector<1x2xf32>
    %151 = arith.mulf %149, %150 : vector<1x2xf32>
    %152 = vector.extract_strided_slice %148 {offsets = [1, 0], sizes = [1, 2], strides = [1, 1]} : vector<2x2xf32> to vector<1x2xf32>
    %cst_79 = arith.constant 3.906250e-03 : f32
    %153 = vector.broadcast %cst_79 : f32 to vector<1x2xf32>
    %154 = arith.mulf %152, %153 : vector<1x2xf32>
    %155 = arith.mulf %151, %151 : vector<1x2xf32>
    %156 = arith.subf %154, %155 : vector<1x2xf32>
    %cst_80 = arith.constant 9.99999974E-6 : f32
    %157 = vector.broadcast %cst_80 : f32 to vector<1x2xf32>
    %158 = arith.addf %156, %157 : vector<1x2xf32>
    %159 = math.rsqrt %158 : vector<1x2xf32>
    %160 = tpu.concatenate %151, %159 in 0 : vector<1x2xf32>, vector<1x2xf32> -> vector<2x2xf32>
    %cst_81 = arith.constant dense<0.000000e+00> : vector<2x64xf32>
    %161 = tpu.matmul %160, %24, %cst_81 {dimension_numbers = #tpu.dot_dimension_numbers<[1], [0], [0], [1], [0, 0, 1, 1], [], []>} : vector<2x2xf32>, vector<2x64xf32>, vector<2x64xf32> -> vector<2x64xf32>
    %162 = vector.extract_strided_slice %161 {offsets = [0, 0], sizes = [1, 64], strides = [1, 1]} : vector<2x64xf32> to vector<1x64xf32>
    %163 = vector.broadcast %162 : vector<1x64xf32> to vector<8x64xf32>
    %164 = arith.subf %144, %163 : vector<8x64xf32>
    %165 = vector.extract_strided_slice %161 {offsets = [1, 0], sizes = [1, 64], strides = [1, 1]} : vector<2x64xf32> to vector<1x64xf32>
    %166 = vector.broadcast %165 : vector<1x64xf32> to vector<8x64xf32>
    %167 = arith.mulf %164, %166 : vector<8x64xf32>
    %cst_82 = arith.constant dense<0.000000e+00> : vector<8x64xf32>
    %168 = tpu.matmul %8, %167, %cst_82 {dimension_numbers = #tpu.dot_dimension_numbers<[1], [0], [0], [1], [0, 0, 1, 1], [], []>} : vector<8x8xf32>, vector<8x64xf32>, vector<8x64xf32> -> vector<8x64xf32>
    %169 = arith.addf %168, %15 : vector<8x64xf32>
    %170 = arith.mulf %169, %169 : vector<8x64xf32>
    %171 = tpu.concatenate %169, %170 in 0 : vector<8x64xf32>, vector<8x64xf32> -> vector<16x64xf32>
    %cst_83 = arith.constant dense<0.000000e+00> : vector<2x64xf32>
    %172 = tpu.matmul %25, %171, %cst_83 {dimension_numbers = #tpu.dot_dimension_numbers<[1], [0], [0], [1], [0, 0, 1, 1], [], []>} : vector<2x16xf32>, vector<16x64xf32>, vector<2x64xf32> -> vector<2x64xf32>
    %173 = vector.extract_strided_slice %172 {offsets = [0, 0], sizes = [1, 64], strides = [1, 1]} : vector<2x64xf32> to vector<1x64xf32>
    %cst_84 = arith.constant 1.250000e-01 : f32
    %174 = vector.broadcast %cst_84 : f32 to vector<1x64xf32>
    %175 = arith.mulf %173, %174 : vector<1x64xf32>
    %176 = vector.extract_strided_slice %172 {offsets = [1, 0], sizes = [1, 64], strides = [1, 1]} : vector<2x64xf32> to vector<1x64xf32>
    %cst_85 = arith.constant 1.250000e-01 : f32
    %177 = vector.broadcast %cst_85 : f32 to vector<1x64xf32>
    %178 = arith.mulf %176, %177 : vector<1x64xf32>
    %179 = arith.mulf %175, %175 : vector<1x64xf32>
    %180 = arith.subf %178, %179 : vector<1x64xf32>
    %181 = vector.broadcast %175 : vector<1x64xf32> to vector<8x64xf32>
    %182 = arith.subf %169, %181 : vector<8x64xf32>
    %cst_86 = arith.constant 9.99999974E-6 : f32
    %183 = vector.broadcast %cst_86 : f32 to vector<1x64xf32>
    %184 = arith.addf %180, %183 : vector<1x64xf32>
    %185 = math.rsqrt %184 : vector<1x64xf32>
    %186 = vector.broadcast %185 : vector<1x64xf32> to vector<8x64xf32>
    %187 = arith.mulf %182, %186 : vector<8x64xf32>
    %188 = arith.mulf %187, %16 : vector<8x64xf32>
    %189 = arith.addf %188, %17 : vector<8x64xf32>
    %cst_87 = arith.constant 0.000000e+00 : f32
    %190 = vector.broadcast %cst_87 : f32 to vector<8x64xf32>
    %191 = tpu.concatenate %189, %190 in 1 : vector<8x64xf32>, vector<8x64xf32> -> vector<8x128xf32>
    %c0_88 = arith.constant 0 : index
    %c0_89 = arith.constant 0 : index
    %192 = vector.load %arg6[%c0_88, %c0_89] : memref<8x128xf32, #tpu.memory_space<vmem>>, vector<8x128xf32>
    tpu.vector_store %arg6[%c0_88, %c0_89], %191 {strides = array<i32>} : memref<8x128xf32, #tpu.memory_space<vmem>>, vector<8x128xf32>,
    return
  }
}

</mosaic_0001>

<bundles_post_ra>
// kernel: optimized_decoder_block.1
= control target key start
LH: loop header
LB: loop body
LE: loop exit
PB: predicated region body
PF: predicated region fallthrough
CT: control target
= control target key end

     0   :  { %s3663_s23 = smov 1   ;;  %vm196_vm0 = vcmask 97280   ;;  %v3664_v2 = vmov 0.0|0.0   ;;  %s3665_s9 = smov 127   ;;  %vm174_vm1 = vcmask 7168   ;;  %vm184_vm2 = vcmask 252928   ;;  %s4818_s0 = inlined_call_operand.vmem [shape: f32[4,32], index: 0, kind: input, shape index: {}]   ;;  %s4819_s2 = inlined_call_operand.vmem [shape: f32[72,128], index: 2, kind: input, shape index: {}]   ;;  %s4820_s3 = inlined_call_operand.vmem [shape: f32[168,64], index: 3, kind: input, shape index: {}]   ;;  %s4821_s1 = inlined_call_operand.vmem [shape: f32[6,64], index: 1, kind: input, shape index: {}]   ;;  %s4822_s4 = inlined_call_operand.vmem [shape: f32[768,64], index: 4, kind: input, shape index: {}]   ;;  %s4823_s5 = inlined_call_operand.vmem [shape: f32[64,256], index: 5, kind: input, shape index: {}]   ;;  %s4824_s6 = inlined_call_operand.vmem [shape: f32[8,128], index: 6, kind: output, shape index: {}]  }
   0x1   :  { %v23_v0 = vld [vmem:[%s4818_s0] sm:$0xf]  ;;  %3406 = vmatprep.subr.bf16.mxu1 %v3664_v2  ;;  %v48_v3 = vld [vmem:[%s4820_s3 + $0x70] sm:$0xff]  ;;  %v49_v4 = vld [vmem:[%s4820_s3 + $0x78] sm:$0xff]  ;;  %vm194_vm3 = vcmask 1043456   ;;  %vm3666_vm4 = vmmov 1  }
   0x2   :  { %171 = vrot.lane.b32.xlu0 %v23_v0, %s3663_s23  ;;  %v25_v1 = vld [vmem:[%s4819_s2] sm:$0xff]  ;;  %v3407_v5 = vpack.c.bf16 %v49_v4, %v48_v3  ;;  %v51_v7 = vld [vmem:[%s4820_s3 + $0x88] sm:$0xff]  ;;  %v2806_v9 = vld [vmem:[%s4820_s3 + $0x92] ss:$0 sm:$0xff]  ;;  %vm3667_vm6 = vmmov 0   ;;  %v3668_v27 = vmov 0.0  }
   0x3   :  { %3145 = vmatprep.mubr.msk.f32.mxu0 %vm196_vm0, %v25_v1  ;;  %v50_v6 = vld [vmem:[%s4820_s3 + $0x80] sm:$0xff]  ;;  %v2807_v13 = vld [vmem:[%s4820_s3 + $0x93] ss:$0 sm:$0xff]  ;;  %vm3401_vm5 = vmpackc.low %vm194_vm3, %vm3666_vm4  ;;  %3156 = vmatprep.mubr.msk.f32.mxu1 %vm3667_vm6, %v3668_v27  ;;  %vm281_vm7 = vcmask 261120   ;;  %vm429_vm8 = vcmask 64512   ;;  %vm510_vm9 = vcmask 1045504  }
   0x4   :  { %3408 = vmatpush3.bf16.msra.mxu1 %v3407_v5  ;;  %v3410_v8 = vpack.c.bf16 %v51_v7, %v50_v6  ;;  %v44_v20 = vld [vmem:[%s4820_s3 + $0x50] sm:$0xff]  ;;  %v45_v21 = vld [vmem:[%s4820_s3 + $0x58] sm:$0xff]  ;;  %v26_v22 = vld [vmem:[%s4819_s2 + $0x8] sm:$0xff]  ;;  %vm503_vm10 = vcmask 48128   ;;  %vm589_vm11 = vcmask 523264   ;;  %vm2177_vm13 = vcmask 130048  }
   0x5   :  { %3409 = vmatprep.subr.bf16.mxu1 %v3664_v2  ;;  %v3413_v23 = vpack.c.bf16 %v45_v21, %v44_v20  ;;  %v46_v24 = vld [vmem:[%s4820_s3 + $0x60] sm:$0xff]  ;;  %v47_v25 = vld [vmem:[%s4820_s3 + $0x68] sm:$0xff]  ;;  %v27_v39 = vld [vmem:[%s4819_s2 + $0x10] sm:$0xff]  ;;  %vm2271_vm14 = vcmask 515072   ;;  %vm2289_vm15 = vcmask 392192  }
   0x6   :  { %181 = vrot.lane.b32.xlu0 %v23_v0, %s3665_s9  ;;  %v3416_v26 = vpack.c.bf16 %v47_v25, %v46_v24  ;;  %v34_v32 = vld [vmem:[%s4820_s3] sm:$0xff]  ;;  %v28_v40 = vld [vmem:[%s4819_s2 + $0x18] sm:$0xff]  ;;  %v35_v42 = vld [vmem:[%s4820_s3 + $0x8] sm:$0xff] }
   0x7   :  { %v29_v37 = vld [vmem:[%s4819_s2 + $0x20] sm:$0xff]  ;;  %v59_v46 = vld [vmem:[%s4822_s4 + $0x8] sm:$0xff]  ;;  %v60_v47 = vld [vmem:[%s4822_s4 + $0x10] sm:$0xff] }
   0x8   :  { %3411 = vmatpush3.bf16.msra.mxu1 %v3410_v8  ;;  %v24_v38 = vld [vmem:[%s4821_s1] sm:$0x3f]  ;;  %v61_v48 = vld [vmem:[%s4822_s4 + $0x18] sm:$0xff]  ;;  %v63_v50 = vld [vmem:[%s4822_s4 + $0x28] sm:$0xff] }
   0x9   :  { %3170 = vmatprep.subr.mxu1 %v3668_v27  ;;  %v58_v41 = vld [vmem:[%s4822_s4] sm:$0xff]  ;;  %v64_v51 = vld [vmem:[%s4822_s4 + $0x30] sm:$0xff]  ;;  %v65_v52 = vld [vmem:[%s4822_s4 + $0x38] sm:$0xff] }
   0xa   :  { %v62_v49 = vld [vmem:[%s4822_s4 + $0x20] sm:$0xff]  ;;  %v67_v54 = vld [vmem:[%s4822_s4 + $0x48] sm:$0xff]  ;;  %v68_v55 = vld [vmem:[%s4822_s4 + $0x50] sm:$0xff] }
   0xb   :  { %v66_v53 = vld [vmem:[%s4822_s4 + $0x40] sm:$0xff]  ;;  %v69_v56 = vld [vmem:[%s4822_s4 + $0x58] sm:$0xff]  ;;  %v71_v58 = vld [vmem:[%s4822_s4 + $0x68] sm:$0xff] }
   0xc   :  { %v70_v57 = vld [vmem:[%s4822_s4 + $0x60] sm:$0xff]  ;;  %v72_v59 = vld [vmem:[%s4822_s4 + $0x70] sm:$0xff]  ;;  %v73_v60 = vld [vmem:[%s4822_s4 + $0x78] sm:$0xff] }
   0xd   :  { %v74_v61 = vld [vmem:[%s4822_s4 + $0x80] sm:$0xff]  ;;  %v75_v62 = vld [vmem:[%s4822_s4 + $0x88] sm:$0xff]  ;;  %v76_v63 = vld [vmem:[%s4822_s4 + $0x90] sm:$0xff] }
   0xe   :  { %v78_v1 = vld [vmem:[%s4822_s4 + $0xa0] sm:$0xff]  ;;  %v79_v3 = vld [vmem:[%s4822_s4 + $0xa8] sm:$0xff]  ;;  %v80_v4 = vld [vmem:[%s4822_s4 + $0xb0] sm:$0xff] }
   0xf   :  { %v81_v5 = vld [vmem:[%s4822_s4 + $0xb8] sm:$0xff]  ;;  %v82_v6 = vld [vmem:[%s4822_s4 + $0xc0] sm:$0xff]  ;;  %v83_v7 = vld [vmem:[%s4822_s4 + $0xc8] sm:$0xff] }
  0x10   :  { %v84_v8 = vld [vmem:[%s4822_s4 + $0xd0] sm:$0xff]  ;;  %v122_v20 = vld [vmem:[%s4822_s4 + $0x200] sm:$0xff]  ;;  %v123_v21 = vld [vmem:[%s4822_s4 + $0x208] sm:$0xff] }
  0x11   :  { %v125_v25 = vld [vmem:[%s4822_s4 + $0x218] sm:$0xff]  ;;  %vm4724_vm12 = vmpackc.low %vm429_vm8, %vm429_vm8 }
  0x74   :  { %v172_v10 = vpop.permute.xlu0 %171 }
  0x75   :  { %v175_v11 = vsel %vm174_vm1, 0.0, %v172_v10  ;;  %v86_v10 = vld [vmem:[%s4822_s4 + $0xe0] sm:$0xff] }
  0x76   :  { %v180_v12 = vmul.f32 %v2806_v9, %v175_v11  ;;  %v85_v9 = vld [vmem:[%s4822_s4 + $0xd8] sm:$0xff]  ;;  %v87_v11 = vld [vmem:[%s4822_s4 + $0xe8] sm:$0xff] }
  0x78   :  { %v192_v14 = vrot.slane %v180_v12, 4  ;;  %v182_v15 = vpop.permute.xlu0 %181  ;;  %v88_v12 = vld [vmem:[%s4822_s4 + $0xf0] sm:$0xff] }
  0x79   :  { %v185_v16 = vsel %vm184_vm2, %v182_v15, 0.0  ;;  %v36_v15 = vld [vmem:[%s4820_s3 + $0x10] sm:$0xff]  ;;  %vm2547_vm2 = vcmask 1040384  }
  0x7a   :  { %v190_v17 = vmul.f32 %v2807_v13, %v185_v16  ;;  %v195_v18 = vsel %vm194_vm3, %v23_v0, %v192_v14  ;;  %v77_v0 = vld [vmem:[%s4822_s4 + $0x98] sm:$0xff]  ;;  %vm2549_vm3 = vcmask 15360  }
  0x7b   :  { %v89_v13 = vld [vmem:[%s4822_s4 + $0xf8] sm:$0xff] }
  0x7c   :  { %v3400_v19 = vpack.c.bf16 %v190_v17, %v195_v18  ;;  %v37_v14 = vld [vmem:[%s4820_s3 + $0x18] sm:$0xff] }
  0x7e   :  { %3402 = vmatprep.subr.msk.bf16.mxu0 %vm3401_vm5, %v3400_v19 }
  0x7f   :  { %3405 = vmatpush3.bf16.msk.msra.mxu0 %vm3401_vm5, %v3400_v19 }
  0x80   :  { %3412 = vmatprep.subr.bf16.mxu0 %v3664_v2 }
  0x82   :  { %3146 = vmatmul.mubr.msk.f32.vlgmr.msra.gmra.mrb[0].mxu0 %vm196_vm0, %v26_v22 }
  0x83   :  { %3414 = vmatpush3.bf16.msra.mxu0 %v3413_v23  ;;  %3167 = vmatprep.mubr.msk.f32.mxu0 %vm3667_vm6, %v3668_v27 }
  0x84   :  { %3415 = vmatprep.subr.bf16.mxu0 %v3664_v2 }
  0x87   :  { %3417 = vmatpush3.bf16.msra.mxu0 %v3416_v26 }
  0x88   :  { %3175 = vmatprep.subr.msk.mxu0 %vm510_vm9, %v24_v38 }
 0x155   :  { %v3147_v28 = vpop.f32.mrb[0].mxu0 }
 0x156   :  { %v272_v29 = vpop.f32.mrb[1].mxu0  ;;  %3157 = vmatmul.mubr.msk.f32.vlgmr.msra.gmra.mrb[0].mxu1 %vm281_vm7, %v3147_v28  ;;  %v124_v28 = vld [vmem:[%s4822_s4 + $0x210] sm:$0xff] }
 0x157   :  { %3168 = vmatmul.mubr.msk.f32.vlgmr.msra.gmra.mrb[2].mxu0 %vm281_vm7, %v272_v29  ;;  %3172 = vmatprep.mubr.msk.f32.mxu1 %vm3667_vm6, %v3668_v27 }
 0x158   :  { %3177 = vmatprep.mubr.msk.f32.mxu0 %vm503_vm10, %v27_v39  ;;  %3176 = vmatpush3.msk.msra.mxu0 %vm510_vm9, %v24_v38 }
 0x15b   :  { %3178 = vmatmul.mubr.msk.f32.vlgmr.msra.gmra.mrb[4].mxu0 %vm503_vm10, %v28_v40  ;;  %v129_v40 = vld [vmem:[%s4822_s4 + $0x238] sm:$0xff] }
 0x229   :  { %v351_v30 = vpop.f32.mrb[0].mxu1 }
 0x22a   :  { %v3158_v31 = vpop.f32.mrb[1].mxu1  ;;  %v424_v33 = vpop.f32.mrb[2].mxu0 }
 0x22b   :  { %v425_v34 = vadd.f32 %v424_v33, %v351_v30  ;;  %v3169_v35 = vpop.f32.mrb[3].mxu0  ;;  %v127_v33 = vld [vmem:[%s4822_s4 + $0x228] sm:$0xff] }
 0x22d   :  { %v3763_v36 = vadd.f32 %v425_v34, %v34_v32  ;;  %v126_v34 = vld [vmem:[%s4822_s4 + $0x220] sm:$0xff] }
 0x22e   :  { %v3179_v16 = vpop.f32.mrb[4].mxu0 }
 0x22f   :  { %3171 = vmatpush3.msra.mxu1 %v3763_v36  ;;  %v586_v17 = vadd.f32 %v3179_v16, %v37_v14  ;;  %v580_v18 = vpop.f32.mrb[5].mxu0  ;;  %v140_v14 = vld [vmem:[%s4822_s4 + $0x290] sm:$0xff] }
 0x230   :  { %3173 = vmatmul.mubr.msk.f32.vlgmr.msra.gmra.mrb[2].mxu1 %vm429_vm8, %v29_v37  ;;  %v581_v19 = vadd.f32 %v580_v18, %v36_v15 }
 0x231   :  { %3182 = vmatprep.mubr.msk.f32.mxu1 %vm589_vm11, %v58_v41  ;;  %v128_v41 = vld [vmem:[%s4822_s4 + $0x230] sm:$0xff] }
 0x232   :  { %3230 = vmatprep.subr.mxu0 %v581_v19 }
 0x233   :  { %3231 = vmatpush3.msra.mxu0 %v581_v19  ;;  %v143_v19 = vld [vmem:[%s4822_s4 + $0x2a8] sm:$0xff] }
 0x303   :  { %v499_v43 = vpop.f32.mrb[2].mxu1 }
 0x304   :  { %v500_v44 = vadd.f32 %v499_v43, %v35_v42  ;;  %v3174_v45 = vpop.f32.mrb[3].mxu1 }
 0x306   :  { %3180 = vmatprep.subr.msk.mxu1 %vm589_vm11, %v500_v44 }
 0x307   :  { %3181 = vmatpush3.xpose.msk.msra.mxu1 %vm589_vm11, %v500_v44 }
 0x308   :  { %3280 = vmatprep.subr.msk.mxu1 %vm589_vm11, %v586_v17 }
 0x30a   :  { %3183 = vmatmul.mubr.msk.f32.vlgmr.msra.gmra.mrb[4].mxu1 %vm589_vm11, %v59_v46  ;;  %v131_v46 = vld [vmem:[%s4822_s4 + $0x248] sm:$0xff] }
 0x30b   :  { %3185 = vmatprep.mubr.msk.f32.mxu1 %vm589_vm11, %v60_v47  ;;  %3281 = vmatpush3.xpose.msk.msra.mxu1 %vm589_vm11, %v586_v17  ;;  %v130_v47 = vld [vmem:[%s4822_s4 + $0x240] sm:$0xff] }
 0x30c   :  { %3388 = vmatprep.subr.mxu1 %v3668_v27 }
 0x30e   :  { %3186 = vmatmul.mubr.msk.f32.gmra.mrb[6].mxu1 %vm589_vm11, %v61_v48 }
 0x30f   :  { %3188 = vmatprep.mubr.msk.f32.mxu1 %vm589_vm11, %v62_v49 }
 0x312   :  { %3189 = vmatmul.mubr.msk.f32.gmra.mrb[8].mxu1 %vm589_vm11, %v63_v50 }
 0x313   :  { %3191 = vmatprep.mubr.msk.f32.mxu1 %vm589_vm11, %v64_v51 }
 0x316   :  { %3192 = vmatmul.mubr.msk.f32.gmra.mrb[10].mxu1 %vm589_vm11, %v65_v52  ;;  %v133_v52 = vld [vmem:[%s4822_s4 + $0x258] sm:$0xff] }
 0x317   :  { %3194 = vmatprep.mubr.msk.f32.mxu1 %vm589_vm11, %v66_v53  ;;  %v132_v53 = vld [vmem:[%s4822_s4 + $0x250] sm:$0xff] }
 0x31a   :  { %3195 = vmatmul.mubr.msk.f32.gmra.mrb[12].mxu1 %vm589_vm11, %v67_v54 }
 0x31b   :  { %3197 = vmatprep.mubr.msk.f32.mxu1 %vm589_vm11, %v68_v55 }
 0x31e   :  { %3198 = vmatmul.mubr.msk.f32.gmra.mrb[14].mxu1 %vm589_vm11, %v69_v56 }
 0x31f   :  { %3200 = vmatprep.mubr.msk.f32.mxu1 %vm589_vm11, %v70_v57 }
 0x322   :  { %3201 = vmatmul.mubr.msk.f32.gmra.mrb[16].mxu1 %vm589_vm11, %v71_v58  ;;  %v135_v58 = vld [vmem:[%s4822_s4 + $0x268] sm:$0xff] }
 0x323   :  { %3203 = vmatprep.mubr.msk.f32.mxu1 %vm589_vm11, %v72_v59  ;;  %v134_v59 = vld [vmem:[%s4822_s4 + $0x260] sm:$0xff] }
 0x326   :  { %3204 = vmatmul.mubr.msk.f32.gmra.mrb[18].mxu1 %vm589_vm11, %v73_v60 }
 0x327   :  { %3206 = vmatprep.mubr.msk.f32.mxu1 %vm589_vm11, %v74_v61 }
 0x32a   :  { %3207 = vmatmul.mubr.msk.f32.gmra.mrb[20].mxu1 %vm589_vm11, %v75_v62 }
 0x32b   :  { %3209 = vmatprep.mubr.msk.f32.mxu1 %vm589_vm11, %v76_v63 }
 0x32e   :  { %3210 = vmatmul.mubr.msk.f32.gmra.mrb[22].mxu1 %vm589_vm11, %v77_v0  ;;  %v137_v0 = vld [vmem:[%s4822_s4 + $0x278] sm:$0xff] }
 0x32f   :  { %3212 = vmatprep.mubr.msk.f32.mxu1 %vm589_vm11, %v78_v1  ;;  %v136_v1 = vld [vmem:[%s4822_s4 + $0x270] sm:$0xff] }
 0x332   :  { %3213 = vmatmul.mubr.msk.f32.gmra.mrb[24].mxu1 %vm589_vm11, %v79_v3 }
 0x333   :  { %3215 = vmatprep.mubr.msk.f32.mxu1 %vm589_vm11, %v80_v4 }
 0x336   :  { %3216 = vmatmul.mubr.msk.f32.gmra.mrb[26].mxu1 %vm589_vm11, %v81_v5 }
 0x337   :  { %3218 = vmatprep.mubr.msk.f32.mxu1 %vm589_vm11, %v82_v6 }
 0x33a   :  { %3219 = vmatmul.mubr.msk.f32.gmra.mrb[28].mxu1 %vm589_vm11, %v83_v7  ;;  %v139_v7 = vld [vmem:[%s4822_s4 + $0x288] sm:$0xff] }
 0x33b   :  { %3221 = vmatprep.mubr.msk.f32.mxu1 %vm589_vm11, %v84_v8  ;;  %v138_v8 = vld [vmem:[%s4822_s4 + $0x280] sm:$0xff] }
 0x33e   :  { %3222 = vmatmul.mubr.msk.f32.gmra.mrb[30].mxu1 %vm589_vm11, %v85_v9 }
 0x33f   :  { %3224 = vmatprep.mubr.msk.f32.mxu1 %vm589_vm11, %v86_v10 }
 0x342   :  { %3225 = vmatmul.mubr.msk.f32.gmra.mrb[32].mxu1 %vm589_vm11, %v87_v11 }
 0x343   :  { %3227 = vmatprep.mubr.msk.f32.mxu1 %vm589_vm11, %v88_v12 }
 0x346   :  { %3228 = vmatmul.mubr.msk.f32.gmra.mrb[34].mxu1 %vm589_vm11, %v89_v13  ;;  %v141_v13 = vld [vmem:[%s4822_s4 + $0x298] sm:$0xff] }
 0x3dd   :  { %v3184_v22 = vpop.f32.mrb[4].mxu1 }
 0x3de   :  { %v755_v23 = vpop.f32.mrb[5].mxu1  ;;  %v915_v26 = vmul.f32 %v3184_v22, %v123_v21 }
 0x3df   :  { %v914_v24 = vmul.f32 %v755_v23, %v122_v20  ;;  %v142_v20 = vld [vmem:[%s4822_s4 + $0x2a0] sm:$0xff] }
 0x3e1   :  { %v3187_v29 = vpop.f32.mrb[6].mxu1  ;;  %3232 = vmatprep.mubr.msk.f32.mxu0 %vm429_vm8, %v914_v24 }
 0x3e2   :  { %v917_v30 = vmul.f32 %v3187_v29, %v125_v25  ;;  %v765_v31 = vpop.f32.mrb[7].mxu1  ;;  %3233 = vmatmul.mubr.msk.f32.vlgmr.msra.gmra.mrb[6].mxu0 %vm429_vm8, %v915_v26  ;;  %v145_v25 = vld [vmem:[%s4822_s4 + $0x2b8] sm:$0xff]  ;;  %v144_v26 = vld [vmem:[%s4822_s4 + $0x2b0] sm:$0xff] }
 0x3e3   :  { %v916_v32 = vmul.f32 %v765_v31, %v124_v28 }
 0x3e5   :  { %v3190_v35 = vpop.f32.mrb[8].mxu1  ;;  %3235 = vmatprep.mubr.msk.f32.mxu0 %vm429_vm8, %v916_v32  ;;  %v147_v32 = vld [vmem:[%s4822_s4 + $0x2c8] sm:$0xff] }
 0x3e6   :  { %v919_v37 = vmul.f32 %v3190_v35, %v127_v33  ;;  %v775_v38 = vpop.f32.mrb[9].mxu1  ;;  %3236 = vmatmul.mubr.msk.f32.gmra.mrb[8].mxu0 %vm429_vm8, %v917_v30  ;;  %v146_v33 = vld [vmem:[%s4822_s4 + $0x2c0] sm:$0xff] }
 0x3e7   :  { %v918_v39 = vmul.f32 %v775_v38, %v126_v34 }
 0x3e9   :  { %v3193_v42 = vpop.f32.mrb[10].mxu1  ;;  %3238 = vmatprep.mubr.msk.f32.mxu0 %vm429_vm8, %v918_v39  ;;  %v149_v39 = vld [vmem:[%s4822_s4 + $0x2d8] sm:$0xff] }
 0x3ea   :  { %v921_v43 = vmul.f32 %v3193_v42, %v129_v40  ;;  %v785_v44 = vpop.f32.mrb[11].mxu1  ;;  %3239 = vmatmul.mubr.msk.f32.gmra.mrb[10].mxu0 %vm429_vm8, %v919_v37  ;;  %v148_v40 = vld [vmem:[%s4822_s4 + $0x2d0] sm:$0xff] }
 0x3eb   :  { %v920_v45 = vmul.f32 %v785_v44, %v128_v41 }
 0x3ed   :  { %v3196_v48 = vpop.f32.mrb[12].mxu1  ;;  %3241 = vmatprep.mubr.msk.f32.mxu0 %vm429_vm8, %v920_v45  ;;  %v151_v45 = vld [vmem:[%s4822_s4 + $0x2e8] sm:$0xff] }
 0x3ee   :  { %v923_v49 = vmul.f32 %v3196_v48, %v131_v46  ;;  %v795_v50 = vpop.f32.mrb[13].mxu1  ;;  %3242 = vmatmul.mubr.msk.f32.gmra.mrb[12].mxu0 %vm429_vm8, %v921_v43  ;;  %v150_v46 = vld [vmem:[%s4822_s4 + $0x2e0] sm:$0xff] }
 0x3ef   :  { %v922_v51 = vmul.f32 %v795_v50, %v130_v47 }
 0x3f1   :  { %v3199_v54 = vpop.f32.mrb[14].mxu1  ;;  %3244 = vmatprep.mubr.msk.f32.mxu0 %vm429_vm8, %v922_v51  ;;  %v153_v51 = vld [vmem:[%s4822_s4 + $0x2f8] sm:$0xff] }
 0x3f2   :  { %v925_v55 = vmul.f32 %v3199_v54, %v133_v52  ;;  %v805_v56 = vpop.f32.mrb[15].mxu1  ;;  %3245 = vmatmul.mubr.msk.f32.gmra.mrb[14].mxu0 %vm429_vm8, %v923_v49  ;;  %v152_v52 = vld [vmem:[%s4822_s4 + $0x2f0] sm:$0xff] }
 0x3f3   :  { %v924_v57 = vmul.f32 %v805_v56, %v132_v53 }
 0x3f5   :  { %v3202_v60 = vpop.f32.mrb[16].mxu1  ;;  %3247 = vmatprep.mubr.msk.f32.mxu0 %vm429_vm8, %v924_v57  ;;  %v91_v57 = vld [vmem:[%s4822_s4 + $0x108] sm:$0xff] }
 0x3f6   :  { %v927_v61 = vmul.f32 %v3202_v60, %v135_v58  ;;  %v815_v62 = vpop.f32.mrb[17].mxu1  ;;  %3248 = vmatmul.mubr.msk.f32.gmra.mrb[16].mxu0 %vm429_vm8, %v925_v55 }
 0x3f7   :  { %v926_v63 = vmul.f32 %v815_v62, %v134_v59  ;;  %v90_v59 = vld [vmem:[%s4822_s4 + $0x100] sm:$0xff] }
 0x3f9   :  { %v3205_v3 = vpop.f32.mrb[18].mxu1  ;;  %3250 = vmatprep.mubr.msk.f32.mxu0 %vm429_vm8, %v926_v63 }
 0x3fa   :  { %v929_v4 = vmul.f32 %v3205_v3, %v137_v0  ;;  %v825_v5 = vpop.f32.mrb[19].mxu1  ;;  %3251 = vmatmul.mubr.msk.f32.gmra.mrb[18].mxu0 %vm429_vm8, %v927_v61  ;;  %v92_v0 = vld [vmem:[%s4822_s4 + $0x110] sm:$0xff] }
 0x3fb   :  { %v928_v6 = vmul.f32 %v825_v5, %v136_v1  ;;  %v93_v1 = vld [vmem:[%s4822_s4 + $0x118] sm:$0xff] }
 0x3fd   :  { %v3208_v9 = vpop.f32.mrb[20].mxu1  ;;  %3253 = vmatprep.mubr.msk.f32.mxu0 %vm429_vm8, %v928_v6 }
 0x3fe   :  { %v931_v10 = vmul.f32 %v3208_v9, %v139_v7  ;;  %v835_v11 = vpop.f32.mrb[21].mxu1  ;;  %3254 = vmatmul.mubr.msk.f32.gmra.mrb[20].mxu0 %vm429_vm8, %v929_v4 }
 0x3ff   :  { %v930_v12 = vmul.f32 %v835_v11, %v138_v8  ;;  %v95_v8 = vld [vmem:[%s4822_s4 + $0x128] sm:$0xff] }
 0x401   :  { %v3211_v15 = vpop.f32.mrb[22].mxu1  ;;  %3256 = vmatprep.mubr.msk.f32.mxu0 %vm429_vm8, %v930_v12 }
 0x402   :  { %v933_v16 = vmul.f32 %v3211_v15, %v141_v13  ;;  %v845_v17 = vpop.f32.mrb[23].mxu1  ;;  %3257 = vmatmul.mubr.msk.f32.gmra.mrb[22].mxu0 %vm429_vm8, %v931_v10 }
 0x403   :  { %v932_v18 = vmul.f32 %v845_v17, %v140_v14  ;;  %v94_v14 = vld [vmem:[%s4822_s4 + $0x120] sm:$0xff] }
 0x405   :  { %v3214_v21 = vpop.f32.mrb[24].mxu1  ;;  %3259 = vmatprep.mubr.msk.f32.mxu0 %vm429_vm8, %v932_v18 }
 0x406   :  { %v935_v22 = vmul.f32 %v3214_v21, %v143_v19  ;;  %v855_v23 = vpop.f32.mrb[25].mxu1  ;;  %3260 = vmatmul.mubr.msk.f32.gmra.mrb[24].mxu0 %vm429_vm8, %v933_v16  ;;  %v97_v19 = vld [vmem:[%s4822_s4 + $0x138] sm:$0xff] }
 0x407   :  { %v934_v24 = vmul.f32 %v855_v23, %v142_v20 }
 0x409   :  { %v3217_v28 = vpop.f32.mrb[26].mxu1  ;;  %3262 = vmatprep.mubr.msk.f32.mxu0 %vm429_vm8, %v934_v24 }
 0x40a   :  { %v937_v29 = vmul.f32 %v3217_v28, %v145_v25  ;;  %v865_v30 = vpop.f32.mrb[27].mxu1  ;;  %3263 = vmatmul.mubr.msk.f32.gmra.mrb[26].mxu0 %vm429_vm8, %v935_v22  ;;  %v101_v22 = vld [vmem:[%s4822_s4 + $0x158] sm:$0xff]  ;;  %v96_v25 = vld [vmem:[%s4822_s4 + $0x130] sm:$0xff] }
 0x40b   :  { %v936_v31 = vmul.f32 %v865_v30, %v144_v26  ;;  %v103_v30 = vld [vmem:[%s4822_s4 + $0x168] sm:$0xff] }
 0x40d   :  { %v3220_v34 = vpop.f32.mrb[28].mxu1  ;;  %3265 = vmatprep.mubr.msk.f32.mxu0 %vm429_vm8, %v936_v31 }
 0x40e   :  { %v939_v35 = vmul.f32 %v3220_v34, %v147_v32  ;;  %v875_v37 = vpop.f32.mrb[29].mxu1  ;;  %3266 = vmatmul.mubr.msk.f32.gmra.mrb[28].mxu0 %vm429_vm8, %v937_v29  ;;  %v99_v34 = vld [vmem:[%s4822_s4 + $0x148] sm:$0xff] }
 0x40f   :  { %v938_v38 = vmul.f32 %v875_v37, %v146_v33 }
 0x411   :  { %v3223_v41 = vpop.f32.mrb[30].mxu1  ;;  %3268 = vmatprep.mubr.msk.f32.mxu0 %vm429_vm8, %v938_v38 }
 0x412   :  { %v941_v42 = vmul.f32 %v3223_v41, %v149_v39  ;;  %v885_v43 = vpop.f32.mrb[31].mxu1  ;;  %3269 = vmatmul.mubr.msk.f32.gmra.mrb[30].mxu0 %vm429_vm8, %v939_v35  ;;  %v105_v39 = vld [vmem:[%s4822_s4 + $0x178] sm:$0xff] }
 0x413   :  { %v940_v44 = vmul.f32 %v885_v43, %v148_v40  ;;  %v98_v43 = vld [vmem:[%s4822_s4 + $0x140] sm:$0xff] }
 0x415   :  { %v3226_v47 = vpop.f32.mrb[32].mxu1  ;;  %3271 = vmatprep.mubr.msk.f32.mxu0 %vm429_vm8, %v940_v44 }
 0x416   :  { %v943_v48 = vmul.f32 %v3226_v47, %v151_v45  ;;  %v895_v49 = vpop.f32.mrb[33].mxu1  ;;  %3272 = vmatmul.mubr.msk.f32.gmra.mrb[32].mxu0 %vm429_vm8, %v941_v42  ;;  %v107_v47 = vld [vmem:[%s4822_s4 + $0x188] sm:$0xff] }
 0x417   :  { %v942_v50 = vmul.f32 %v895_v49, %v150_v46 }
 0x419   :  { %v3229_v53 = vpop.f32.mrb[34].mxu1  ;;  %3274 = vmatprep.mubr.msk.f32.mxu0 %vm429_vm8, %v942_v50 }
 0x41a   :  { %v945_v54 = vmul.f32 %v3229_v53, %v153_v51  ;;  %v905_v55 = vpop.f32.mrb[35].mxu1  ;;  %3275 = vmatmul.mubr.msk.f32.gmra.mrb[34].mxu0 %vm429_vm8, %v943_v48  ;;  %v100_v51 = vld [vmem:[%s4822_s4 + $0x150] sm:$0xff] }
 0x41b   :  { %v944_v56 = vmul.f32 %v905_v55, %v152_v52  ;;  %v109_v55 = vld [vmem:[%s4822_s4 + $0x198] sm:$0xff] }
 0x41d   :  { %3277 = vmatprep.mubr.msk.f32.mxu0 %vm429_vm8, %v944_v56 }
 0x41e   :  { %3278 = vmatmul.mubr.msk.f32.gmra.mrb[36].mxu0 %vm429_vm8, %v945_v54 }
 0x4b5   :  { %v3234_v58 = vpop.f32.mrb[6].mxu0 }
 0x4b6   :  { %v4055_v60 = vadd.f32 %v3234_v58, %v91_v57  ;;  %v1108_v61 = vpop.f32.mrb[7].mxu0 }
 0x4b7   :  { %v4057_v62 = vadd.f32 %v1108_v61, %v90_v59  ;;  %v102_v59 = vld [vmem:[%s4822_s4 + $0x160] sm:$0xff] }
 0x4b8   :  { %v1270_v63 = vsel %vm589_vm11, %v4055_v60, -inf }
 0x4b9   :  { %1271 = vmax.xlane.f32.xlu1 %v1270_v63  ;;  %v3237_v3 = vpop.f32.mrb[8].mxu0  ;;  %v1267_v7 = vsel %vm589_vm11, %v4057_v62, -inf }
 0x4ba   :  { %v1118_v4 = vpop.f32.mrb[9].mxu0  ;;  %v4069_v6 = vadd.f32 %v3237_v3, %v93_v1  ;;  %v111_v1 = vld [vmem:[%s4822_s4 + $0x1a8] sm:$0xff] }
 0x4bb   :  { %v4067_v5 = vadd.f32 %v1118_v4, %v92_v0 }
 0x4bc   :  { %v1276_v13 = vsel %vm589_vm11, %v4069_v6, -inf }
 0x4bd   :  { %1268 = vmax.xlane.f32.xlu1 %v1267_v7  ;;  %v3240_v9 = vpop.f32.mrb[10].mxu0  ;;  %v1273_v10 = vsel %vm589_vm11, %v4067_v5, -inf }
 0x4be   :  { %1274 = vmax.xlane.f32.xlu0 %v1273_v10  ;;  %v1128_v11 = vpop.f32.mrb[11].mxu0  ;;  %v4078_v12 = vadd.f32 %v3240_v9, %v95_v8  ;;  %v104_v8 = vld [vmem:[%s4822_s4 + $0x170] sm:$0xff] }
 0x4bf   :  { %v4085_v17 = vadd.f32 %v1128_v11, %v94_v14 }
 0x4c0   :  { %v1282_v18 = vsel %vm589_vm11, %v4078_v12, -inf }
 0x4c1   :  { %1277 = vmax.xlane.f32.xlu1 %v1276_v13  ;;  %v3243_v15 = vpop.f32.mrb[12].mxu0  ;;  %v1279_v24 = vsel %vm589_vm11, %v4085_v17, -inf  ;;  %v113_v13 = vld [vmem:[%s4822_s4 + $0x1b8] sm:$0xff] }
 0x4c2   :  { %v1138_v16 = vpop.f32.mrb[13].mxu0  ;;  %v4095_v23 = vadd.f32 %v3243_v15, %v97_v19 }
 0x4c3   :  { %v4107_v31 = vadd.f32 %v1138_v16, %v96_v25 }
 0x4c4   :  { %v1288_v33 = vsel %vm589_vm11, %v4095_v23, -inf }
 0x4c5   :  { %1283 = vmax.xlane.f32.xlu1 %v1282_v18  ;;  %v3246_v20 = vpop.f32.mrb[14].mxu0  ;;  %v1285_v42 = vsel %vm589_vm11, %v4107_v31, -inf  ;;  %v106_v18 = vld [vmem:[%s4822_s4 + $0x180] sm:$0xff] }
 0x4c6   :  { %v1148_v21 = vpop.f32.mrb[15].mxu0  ;;  %v4121_v40 = vadd.f32 %v3246_v20, %v99_v34  ;;  %v117_v34 = vld [vmem:[%s4822_s4 + $0x1d8] sm:$0xff] }
 0x4c7   :  { %v4135_v48 = vadd.f32 %v1148_v21, %v98_v43 }
 0x4c8   :  { %v1294_v50 = vsel %vm589_vm11, %v4121_v40, -inf }
 0x4c9   :  { %v3249_v26 = vpop.f32.mrb[16].mxu0  ;;  %1280 = vmax.xlane.f32.xlu1 %v1279_v24  ;;  %v1291_v58 = vsel %vm589_vm11, %v4135_v48, -inf }
 0x4ca   :  { %v4102_v28 = vadd.f32 %v3249_v26, %v101_v22  ;;  %v1158_v29 = vpop.f32.mrb[17].mxu0  ;;  %v115_v22 = vld [vmem:[%s4822_s4 + $0x1c8] sm:$0xff] }
 0x4cb   :  { %v4149_v56 = vadd.f32 %v1158_v29, %v100_v51  ;;  %v108_v29 = vld [vmem:[%s4822_s4 + $0x190] sm:$0xff] }
 0x4cc   :  { %v1300_v32 = vsel %vm589_vm11, %v4102_v28, -inf  ;;  %v112_v51 = vld [vmem:[%s4822_s4 + $0x1b0] sm:$0xff] }
 0x4cd   :  { %v3252_v35 = vpop.f32.mrb[18].mxu0  ;;  %1301 = vmax.xlane.f32.xlu0 %v1300_v32  ;;  %1289 = vmax.xlane.f32.xlu1 %v1288_v33  ;;  %v1297_v7 = vsel %vm589_vm11, %v4149_v56, -inf }
 0x4ce   :  { %v4116_v37 = vadd.f32 %v3252_v35, %v103_v30  ;;  %v1168_v38 = vpop.f32.mrb[19].mxu0 }
 0x4cf   :  { %v4163_v3 = vadd.f32 %v1168_v38, %v102_v59 }
 0x4d0   :  { %v1306_v41 = vsel %vm589_vm11, %v4116_v37, -inf }
 0x4d1   :  { %v3255_v44 = vpop.f32.mrb[20].mxu0  ;;  %1307 = vmax.xlane.f32.xlu0 %v1306_v41  ;;  %1286 = vmax.xlane.f32.xlu1 %v1285_v42  ;;  %v1303_v16 = vsel %vm589_vm11, %v4163_v3, -inf  ;;  %v110_v41 = vld [vmem:[%s4822_s4 + $0x1a0] sm:$0xff] }
 0x4d2   :  { %v4130_v45 = vadd.f32 %v3255_v44, %v105_v39  ;;  %v1178_v46 = vpop.f32.mrb[21].mxu0 }
 0x4d3   :  { %v4177_v14 = vadd.f32 %v1178_v46, %v104_v8  ;;  %v119_v46 = vld [vmem:[%s4822_s4 + $0x1e8] sm:$0xff] }
 0x4d4   :  { %v1312_v49 = vsel %vm589_vm11, %v4130_v45, -inf }
 0x4d5   :  { %v3258_v52 = vpop.f32.mrb[22].mxu0  ;;  %1313 = vmax.xlane.f32.xlu0 %v1312_v49  ;;  %1295 = vmax.xlane.f32.xlu1 %v1294_v50  ;;  %v1309_v26 = vsel %vm589_vm11, %v4177_v14, -inf }
 0x4d6   :  { %v4144_v53 = vadd.f32 %v3258_v52, %v107_v47  ;;  %v1188_v54 = vpop.f32.mrb[23].mxu0 }
 0x4d7   :  { %v4191_v24 = vadd.f32 %v1188_v54, %v106_v18  ;;  %v118_v18 = vld [vmem:[%s4822_s4 + $0x1e0] sm:$0xff] }
 0x4d8   :  { %v1318_v57 = vsel %vm589_vm11, %v4144_v53, -inf }
 0x4d9   :  { %v3261_v61 = vpop.f32.mrb[24].mxu0  ;;  %1319 = vmax.xlane.f32.xlu0 %v1318_v57  ;;  %1292 = vmax.xlane.f32.xlu1 %v1291_v58  ;;  %v1315_v39 = vsel %vm589_vm11, %v4191_v24, -inf  ;;  %v121_v57 = vld [vmem:[%s4822_s4 + $0x1f8] sm:$0xff] }
 0x4da   :  { %v4158_v63 = vadd.f32 %v3261_v61, %v109_v55  ;;  %v1198_v0 = vpop.f32.mrb[25].mxu0 }
 0x4db   :  { %v4205_v35 = vadd.f32 %v1198_v0, %v108_v29  ;;  %v114_v0 = vld [vmem:[%s4822_s4 + $0x1c0] sm:$0xff] }
 0x4dc   :  { %v1324_v4 = vsel %vm589_vm11, %v4158_v63, -inf }
 0x4dd   :  { %v3264_v9 = vpop.f32.mrb[26].mxu0  ;;  %1325 = vmax.xlane.f32.xlu0 %v1324_v4  ;;  %1298 = vmax.xlane.f32.xlu1 %v1297_v7  ;;  %v1321_v50 = vsel %vm589_vm11, %v4205_v35, -inf }
 0x4de   :  { %v4172_v10 = vadd.f32 %v3264_v9, %v111_v1  ;;  %v1208_v11 = vpop.f32.mrb[27].mxu0 }
 0x4df   :  { %v4219_v47 = vadd.f32 %v1208_v11, %v110_v41 }
 0x4e0   :  { %v1330_v15 = vsel %vm589_vm11, %v4172_v10, -inf }
 0x4e1   :  { %v3267_v19 = vpop.f32.mrb[28].mxu0  ;;  %1331 = vmax.xlane.f32.xlu0 %v1330_v15  ;;  %1304 = vmax.xlane.f32.xlu1 %v1303_v16  ;;  %v1327_v61 = vsel %vm589_vm11, %v4219_v47, -inf }
 0x4e2   :  { %v4186_v20 = vadd.f32 %v3267_v19, %v113_v13  ;;  %v1218_v21 = vpop.f32.mrb[29].mxu0  ;;  %v116_v13 = vld [vmem:[%s4822_s4 + $0x1d0] sm:$0xff] }
 0x4e3   :  { %v4233_v58 = vadd.f32 %v1218_v21, %v112_v51 }
 0x4e4   :  { %v1336_v25 = vsel %vm589_vm11, %v4186_v20, -inf }
 0x4e5   :  { %v3270_v30 = vpop.f32.mrb[30].mxu0  ;;  %1337 = vmax.xlane.f32.xlu0 %v1336_v25  ;;  %1310 = vmax.xlane.f32.xlu1 %v1309_v26  ;;  %v1333_v11 = vsel %vm589_vm11, %v4233_v58, -inf }
 0x4e6   :  { %v4200_v32 = vadd.f32 %v3270_v30, %v115_v22  ;;  %v1228_v33 = vpop.f32.mrb[31].mxu0  ;;  %v120_v22 = vld [vmem:[%s4822_s4 + $0x1f0] sm:$0xff] }
 0x4e7   :  { %v4244_v8 = vadd.f32 %v1228_v33, %v114_v0 }
 0x4e8   :  { %v1342_v38 = vsel %vm589_vm11, %v4200_v32, -inf }
 0x4e9   :  { %v3273_v42 = vpop.f32.mrb[32].mxu0  ;;  %1343 = vmax.xlane.f32.xlu0 %v1342_v38  ;;  %1316 = vmax.xlane.f32.xlu1 %v1315_v39  ;;  %v1339_v16 = vsel %vm589_vm11, %v4244_v8, -inf }
 0x4ea   :  { %v4214_v43 = vadd.f32 %v3273_v42, %v117_v34  ;;  %v1238_v44 = vpop.f32.mrb[33].mxu0 }
 0x4eb   :  { %v4253_v15 = vadd.f32 %v1238_v44, %v116_v13 }
 0x4ec   :  { %v1348_v49 = vsel %vm589_vm11, %v4214_v43, -inf }
 0x4ed   :  { %v3276_v52 = vpop.f32.mrb[34].mxu0  ;;  %1349 = vmax.xlane.f32.xlu0 %v1348_v49  ;;  %1322 = vmax.xlane.f32.xlu1 %v1321_v50  ;;  %v1345_v21 = vsel %vm589_vm11, %v4253_v15, -inf }
 0x4ee   :  { %v4228_v54 = vadd.f32 %v3276_v52, %v119_v46  ;;  %v1248_v55 = vpop.f32.mrb[35].mxu0 }
 0x4ef   :  { %v4260_v19 = vadd.f32 %v1248_v55, %v118_v18 }
 0x4f0   :  { %v1354_v59 = vsel %vm589_vm11, %v4228_v54, -inf }
 0x4f1   :  { %v3279_v1 = vpop.f32.mrb[36].mxu0  ;;  %1355 = vmax.xlane.f32.xlu0 %v1354_v59  ;;  %1328 = vmax.xlane.f32.xlu1 %v1327_v61  ;;  %v1351_v26 = vsel %vm589_vm11, %v4260_v19, -inf }
 0x4f2   :  { %v4242_v4 = vadd.f32 %v3279_v1, %v121_v57  ;;  %v1258_v7 = vpop.f32.mrb[37].mxu0 }
 0x4f3   :  { %v4267_v25 = vadd.f32 %v1258_v7, %v120_v22 }
 0x4f4   :  { %v1360_v9 = vsel %vm589_vm11, %v4242_v4, -inf }
 0x4f5   :  { %1361 = vmax.xlane.f32.xlu0 %v1360_v9  ;;  %1334 = vmax.xlane.f32.xlu1 %v1333_v11  ;;  %v1357_v29 = vsel %vm589_vm11, %v4267_v25, -inf }
 0x4f9   :  { %1340 = vmax.xlane.f32.xlu1 %v1339_v16 }
 0x4fd   :  { %1346 = vmax.xlane.f32.xlu1 %v1345_v21 }
 0x501   :  { %1352 = vmax.xlane.f32.xlu1 %v1351_v26 }
 0x505   :  { %1358 = vmax.xlane.f32.xlu1 %v1357_v29 }
 0x546   :  { %v1272_v30 = vpop.xlane.xlu1 %1271 }
 0x547   :  { %v1364_v33 = vsub.f32 %v4055_v60, %v1272_v30 }
 0x549   :  { %v1397_v34 = vmul.f32 1.442695, %v1364_v33 }
 0x54a   :  { %v1269_v38 = vpop.xlane.xlu1 %1268 }
 0x54b   :  { %3491 = vpow2.f32 %v1397_v34  ;;  %v1363_v39 = vsub.f32 %v4057_v62, %v1269_v38  ;;  %v1275_v41 = vpop.xlane.xlu0 %1274 }
 0x54c   :  { %v1365_v42 = vsub.f32 %v4067_v5, %v1275_v41 }
 0x54d   :  { %v1395_v44 = vmul.f32 1.442695, %v1363_v39 }
 0x54e   :  { %v1399_v46 = vmul.f32 1.442695, %v1365_v42  ;;  %v1278_v49 = vpop.xlane.xlu1 %1277 }
 0x54f   :  { %3493 = vpow2.f32 %v1395_v44  ;;  %v1366_v50 = vsub.f32 %v4069_v6, %v1278_v49 }
 0x550   :  { %3495 = vpow2.f32 %v1399_v46 }
 0x551   :  { %v1401_v51 = vmul.f32 1.442695, %v1366_v50 }
 0x552   :  { %v1284_v52 = vpop.xlane.xlu1 %1283 }
 0x553   :  { %3497 = vpow2.f32 %v1401_v51  ;;  %v1368_v60 = vsub.f32 %v4078_v12, %v1284_v52 }
 0x555   :  { %v4278_v55 = vpop.eup %3491  ;;  %v1405_v57 = vmul.f32 1.442695, %v1368_v60 }
 0x556   :  { %v1281_v59 = vpop.xlane.xlu1 %1280  ;;  %v1462_v62 = vsel %vm589_vm11, %v4278_v55, 0.0 }
 0x557   :  { %3499 = vpow2.f32 %v1405_v57  ;;  %v1367_v5 = vsub.f32 %v4085_v17, %v1281_v59  ;;  %1463 = vadd.xlane.f32.xlu0 %v1462_v62 }
 0x559   :  { %v4283_v61 = vpop.eup %3493  ;;  %v1403_v6 = vmul.f32 1.442695, %v1367_v5 }
 0x55a   :  { %v1302_v0 = vpop.xlane.xlu0 %1301  ;;  %v1290_v1 = vpop.xlane.xlu1 %1289  ;;  %v1459_v7 = vsel %vm589_vm11, %v4283_v61, 0.0 }
 0x55b   :  { %v4287_v12 = vpop.eup %3495  ;;  %3501 = vpow2.f32 %v1403_v6  ;;  %v1370_v9 = vsub.f32 %v4095_v23, %v1290_v1  ;;  %1460 = vadd.xlane.f32.xlu1 %v1459_v7  ;;  %v1374_v29 = vsub.f32 %v4102_v28, %v1302_v0 }
 0x55c   :  { %v1465_v18 = vsel %vm589_vm11, %v4287_v12, 0.0 }
 0x55d   :  { %v4290_v11 = vpop.eup %3497  ;;  %v1409_v13 = vmul.f32 1.442695, %v1370_v9  ;;  %v1417_v41 = vmul.f32 1.442695, %v1374_v29 }
 0x55e   :  { %v1308_v16 = vpop.xlane.xlu0 %1307  ;;  %v1287_v17 = vpop.xlane.xlu1 %1286  ;;  %v1468_v21 = vsel %vm589_vm11, %v4290_v11, 0.0 }
 0x55f   :  { %v1369_v22 = vsub.f32 %v4107_v31, %v1287_v17  ;;  %1466 = vadd.xlane.f32.xlu1 %v1465_v18  ;;  %1469 = vadd.xlane.f32.xlu0 %v1468_v21  ;;  %3503 = vpow2.f32 %v1409_v13  ;;  %v1376_v42 = vsub.f32 %v4116_v37, %v1308_v16 }
 0x561   :  { %v4297_v26 = vpop.eup %3499  ;;  %v1407_v23 = vmul.f32 1.442695, %v1369_v22 }
 0x562   :  { %v1314_v30 = vpop.xlane.xlu0 %1313  ;;  %v1296_v33 = vpop.xlane.xlu1 %1295  ;;  %v1474_v34 = vsel %vm589_vm11, %v4297_v26, 0.0 }
 0x563   :  { %v1372_v38 = vsub.f32 %v4121_v40, %v1296_v33  ;;  %1475 = vadd.xlane.f32.xlu0 %v1474_v34  ;;  %3505 = vpow2.f32 %v1407_v23  ;;  %v1421_v40 = vmul.f32 1.442695, %v1376_v42  ;;  %v1378_v52 = vsub.f32 %v4130_v45, %v1314_v30 }
 0x565   :  { %v4303_v39 = vpop.eup %3501  ;;  %v1413_v31 = vmul.f32 1.442695, %v1372_v38  ;;  %v1425_v5 = vmul.f32 1.442695, %v1378_v52 }
 0x566   :  { %v1320_v44 = vpop.xlane.xlu0 %1319  ;;  %v1293_v46 = vpop.xlane.xlu1 %1292  ;;  %v1471_v28 = vsel %vm589_vm11, %v4303_v39, 0.0 }
 0x567   :  { %v1371_v49 = vsub.f32 %v4135_v48, %v1293_v46  ;;  %1472 = vadd.xlane.f32.xlu1 %v1471_v28  ;;  %3507 = vpow2.f32 %v1413_v31  ;;  %v1380_v6 = vsub.f32 %v4144_v53, %v1320_v44 }
 0x568   :  { %3509 = vpow2.f32 %v1417_v41 }
 0x569   :  { %v1411_v50 = vmul.f32 1.442695, %v1371_v49  ;;  %v4309_v51 = vpop.eup %3503  ;;  %v1429_v13 = vmul.f32 1.442695, %v1380_v6 }
 0x56a   :  { %v1326_v60 = vpop.xlane.xlu0 %1325  ;;  %v1299_v57 = vpop.xlane.xlu1 %1298  ;;  %v1480_v59 = vsel %vm589_vm11, %v4309_v51, 0.0 }
 0x56b   :  { %v1373_v37 = vsub.f32 %v4149_v56, %v1299_v57  ;;  %3511 = vpow2.f32 %v1411_v50  ;;  %1481 = vadd.xlane.f32.xlu0 %v1480_v59  ;;  %v1382_v16 = vsub.f32 %v4158_v63, %v1326_v60 }
 0x56c   :  { %3513 = vpow2.f32 %v1421_v40 }
 0x56d   :  { %v1415_v62 = vmul.f32 1.442695, %v1373_v37  ;;  %v4315_v48 = vpop.eup %3505  ;;  %v1433_v29 = vmul.f32 1.442695, %v1382_v16 }
 0x56e   :  { %v1332_v0 = vpop.xlane.xlu0 %1331  ;;  %v1305_v1 = vpop.xlane.xlu1 %1304  ;;  %v1477_v7 = vsel %vm589_vm11, %v4315_v48, 0.0 }
 0x56f   :  { %v1375_v45 = vsub.f32 %v4163_v3, %v1305_v1  ;;  %3515 = vpow2.f32 %v1415_v62  ;;  %1478 = vadd.xlane.f32.xlu1 %v1477_v7  ;;  %v1384_v30 = vsub.f32 %v4172_v10, %v1332_v0 }
 0x570   :  { %3517 = vpow2.f32 %v1425_v5 }
 0x571   :  { %v1419_v56 = vmul.f32 1.442695, %v1375_v45  ;;  %v4321_v9 = vpop.eup %3507  ;;  %v1437_v10 = vmul.f32 1.442695, %v1384_v30 }
 0x572   :  { %v1338_v17 = vpop.xlane.xlu0 %1337  ;;  %v1311_v18 = vpop.xlane.xlu1 %1310  ;;  %v1486_v21 = vsel %vm589_vm11, %v4321_v9, 0.0 }
 0x573   :  { %v1377_v53 = vsub.f32 %v4177_v14, %v1311_v18  ;;  %v4327_v3 = vpop.eup %3509  ;;  %3519 = vpow2.f32 %v1419_v56  ;;  %1487 = vadd.xlane.f32.xlu0 %v1486_v21  ;;  %v1386_v44 = vsub.f32 %v4186_v20, %v1338_v17 }
 0x574   :  { %3521 = vpow2.f32 %v1429_v13  ;;  %v1492_v14 = vsel %vm589_vm11, %v4327_v3, 0.0 }
 0x575   :  { %v1423_v22 = vmul.f32 1.442695, %v1377_v53  ;;  %v4329_v23 = vpop.eup %3511  ;;  %v1441_v20 = vmul.f32 1.442695, %v1386_v44 }
 0x576   :  { %v1344_v33 = vpop.xlane.xlu0 %1343  ;;  %v1317_v63 = vpop.xlane.xlu1 %1316  ;;  %v1483_v38 = vsel %vm589_vm11, %v4329_v23, 0.0 }
 0x577   :  { %v1379_v34 = vsub.f32 %v4191_v24, %v1317_v63  ;;  %v4337_v31 = vpop.eup %3513  ;;  %3523 = vpow2.f32 %v1423_v22  ;;  %1493 = vadd.xlane.f32.xlu0 %v1492_v14  ;;  %1484 = vadd.xlane.f32.xlu1 %v1483_v38  ;;  %v1388_v57 = vsub.f32 %v4200_v32, %v1344_v33 }
 0x578   :  { %3525 = vpow2.f32 %v1433_v29  ;;  %v1498_v49 = vsel %vm589_vm11, %v4337_v31, 0.0 }
 0x579   :  { %v1427_v41 = vmul.f32 1.442695, %v1379_v34  ;;  %v4339_v42 = vpop.eup %3515  ;;  %v1445_v32 = vmul.f32 1.442695, %v1388_v57 }
 0x57a   :  { %v1323_v46 = vpop.xlane.xlu1 %1322  ;;  %v1350_v24 = vpop.xlane.xlu0 %1349  ;;  %v1489_v50 = vsel %vm589_vm11, %v4339_v42, 0.0 }
 0x57b   :  { %v1381_v28 = vsub.f32 %v4205_v35, %v1323_v46  ;;  %v4347_v40 = vpop.eup %3517  ;;  %3527 = vpow2.f32 %v1427_v41  ;;  %1499 = vadd.xlane.f32.xlu0 %v1498_v49  ;;  %1490 = vadd.xlane.f32.xlu1 %v1489_v50  ;;  %v1390_v45 = vsub.f32 %v4214_v43, %v1350_v24 }
 0x57c   :  { %3529 = vpow2.f32 %v1437_v10  ;;  %v1504_v59 = vsel %vm589_vm11, %v4347_v40, 0.0 }
 0x57d   :  { %v1431_v52 = vmul.f32 1.442695, %v1381_v28  ;;  %v4349_v60 = vpop.eup %3519  ;;  %v1449_v53 = vmul.f32 1.442695, %v1390_v45 }
 0x57e   :  { %v1329_v37 = vpop.xlane.xlu1 %1328  ;;  %v1495_v62 = vsel %vm589_vm11, %v4349_v60, 0.0  ;;  %v4357_v5 = vpop.eup %3521 }
 0x57f   :  { %v1383_v35 = vsub.f32 %v4219_v47, %v1329_v37  ;;  %3531 = vpow2.f32 %v1431_v52  ;;  %1505 = vadd.xlane.f32.xlu0 %v1504_v59  ;;  %1496 = vadd.xlane.f32.xlu1 %v1495_v62  ;;  %v1356_v6 = vpop.xlane.xlu0 %1355  ;;  %v1510_v56 = vsel %vm589_vm11, %v4357_v5, 0.0 }
 0x580   :  { %3533 = vpow2.f32 %v1441_v20  ;;  %v1392_v43 = vsub.f32 %v4228_v54, %v1356_v6 }
 0x581   :  { %v1435_v0 = vmul.f32 1.442695, %v1383_v35  ;;  %v4359_v1 = vpop.eup %3523 }
 0x582   :  { %v1335_v47 = vpop.xlane.xlu1 %1334  ;;  %v1501_v13 = vsel %vm589_vm11, %v4359_v1, 0.0  ;;  %v4367_v16 = vpop.eup %3525  ;;  %v1453_v54 = vmul.f32 1.442695, %v1392_v43 }
 0x583   :  { %v1385_v7 = vsub.f32 %v4233_v58, %v1335_v47  ;;  %3535 = vpow2.f32 %v1435_v0  ;;  %1511 = vadd.xlane.f32.xlu0 %v1510_v56  ;;  %1502 = vadd.xlane.f32.xlu1 %v1501_v13  ;;  %v1362_v58 = vpop.xlane.xlu0 %1361  ;;  %v1516_v29 = vsel %vm589_vm11, %v4367_v16, 0.0 }
 0x584   :  { %3537 = vpow2.f32 %v1445_v32  ;;  %v1394_v14 = vsub.f32 %v4242_v4, %v1362_v58 }
 0x585   :  { %v1439_v17 = vmul.f32 1.442695, %v1385_v7  ;;  %v4369_v18 = vpop.eup %3527 }
 0x586   :  { %v1341_v21 = vpop.xlane.xlu1 %1340  ;;  %v1507_v30 = vsel %vm589_vm11, %v4369_v18, 0.0  ;;  %v4377_v33 = vpop.eup %3529  ;;  %v1457_v28 = vmul.f32 1.442695, %v1394_v14 }
 0x587   :  { %v1387_v22 = vsub.f32 %v4244_v8, %v1341_v21  ;;  %3539 = vpow2.f32 %v1439_v17  ;;  %1517 = vadd.xlane.f32.xlu0 %v1516_v29  ;;  %1508 = vadd.xlane.f32.xlu1 %v1507_v30  ;;  %v1522_v41 = vsel %vm589_vm11, %v4377_v33, 0.0 }
 0x588   :  { %3541 = vpow2.f32 %v1449_v53 }
 0x589   :  { %v1443_v63 = vmul.f32 1.442695, %v1387_v22  ;;  %v4379_v34 = vpop.eup %3531 }
 0x58a   :  { %v1347_v38 = vpop.xlane.xlu1 %1346  ;;  %v1513_v10 = vsel %vm589_vm11, %v4379_v34, 0.0  ;;  %v4387_v44 = vpop.eup %3533 }
 0x58b   :  { %3543 = vpow2.f32 %v1443_v63  ;;  %v1389_v8 = vsub.f32 %v4253_v15, %v1347_v38  ;;  %1523 = vadd.xlane.f32.xlu0 %v1522_v41  ;;  %1514 = vadd.xlane.f32.xlu1 %v1513_v10  ;;  %v1528_v15 = vsel %vm589_vm11, %v4387_v44, 0.0 }
 0x58c   :  { %3545 = vpow2.f32 %v1453_v54 }
 0x58d   :  { %v1447_v46 = vmul.f32 1.442695, %v1389_v8  ;;  %v4389_v24 = vpop.eup %3535 }
 0x58e   :  { %v1353_v4 = vpop.xlane.xlu1 %1352  ;;  %v1519_v50 = vsel %vm589_vm11, %v4389_v24, 0.0  ;;  %v4396_v52 = vpop.eup %3537 }
 0x58f   :  { %3547 = vpow2.f32 %v1447_v46  ;;  %v1391_v49 = vsub.f32 %v4260_v19, %v1353_v4  ;;  %1529 = vadd.xlane.f32.xlu0 %v1528_v15  ;;  %1520 = vadd.xlane.f32.xlu1 %v1519_v50  ;;  %v1534_v19 = vsel %vm589_vm11, %v4396_v52, 0.0 }
 0x590   :  { %3549 = vpow2.f32 %v1457_v28 }
 0x591   :  { %v1451_v20 = vmul.f32 1.442695, %v1391_v49  ;;  %v4398_v57 = vpop.eup %3539 }
 0x592   :  { %v1359_v37 = vpop.xlane.xlu1 %1358  ;;  %v1525_v59 = vsel %vm589_vm11, %v4398_v57, 0.0  ;;  %v4405_v62 = vpop.eup %3541 }
 0x593   :  { %3551 = vpow2.f32 %v1451_v20  ;;  %v1393_v35 = vsub.f32 %v4267_v25, %v1359_v37  ;;  %1535 = vadd.xlane.f32.xlu0 %v1534_v19  ;;  %1526 = vadd.xlane.f32.xlu1 %v1525_v59  ;;  %v1540_v25 = vsel %vm589_vm11, %v4405_v62, 0.0 }
 0x595   :  { %v4407_v6 = vpop.eup %3543  ;;  %v1455_v0 = vmul.f32 1.442695, %v1393_v35 }
 0x596   :  { %v1531_v32 = vsel %vm589_vm11, %v4407_v6, 0.0  ;;  %v4413_v45 = vpop.eup %3545 }
 0x597   :  { %3553 = vpow2.f32 %v1455_v0  ;;  %1541 = vadd.xlane.f32.xlu0 %v1540_v25  ;;  %1532 = vadd.xlane.f32.xlu1 %v1531_v32  ;;  %v1546_v56 = vsel %vm589_vm11, %v4413_v45, 0.0 }
 0x599   :  { %v4415_v47 = vpop.eup %3547 }
 0x59a   :  { %v1537_v7 = vsel %vm589_vm11, %v4415_v47, 0.0  ;;  %v4421_v13 = vpop.eup %3549 }
 0x59b   :  { %1547 = vadd.xlane.f32.xlu0 %v1546_v56  ;;  %1538 = vadd.xlane.f32.xlu1 %v1537_v7  ;;  %v1552_v43 = vsel %vm589_vm11, %v4421_v13, 0.0 }
 0x59d   :  { %v4423_v17 = vpop.eup %3551 }
 0x59e   :  { %v1543_v53 = vsel %vm589_vm11, %v4423_v17, 0.0 }
 0x59f   :  { %1553 = vadd.xlane.f32.xlu0 %v1552_v43  ;;  %1544 = vadd.xlane.f32.xlu1 %v1543_v53 }
 0x5a1   :  { %v4429_v21 = vpop.eup %3553 }
 0x5a2   :  { %v1549_v58 = vsel %vm589_vm11, %v4429_v21, 0.0 }
 0x5a3   :  { %1550 = vadd.xlane.f32.xlu1 %v1549_v58 }
 0x5b4   :  { %2259 = vrot.lane.b32.xlu1 %v3763_v36, %s3663_s23 }
 0x5b5   :  { %2268 = vrot.lane.b32.xlu0 %v3763_v36, %s3665_s9 }
 0x5e4   :  { %v1464_v22 = vpop.xlane.xlu0 %1463 }
 0x5e5   :  { %3555 = vrcp.f32 %v1464_v22 }
 0x5e8   :  { %v1461_v29 = vpop.xlane.xlu1 %1460 }
 0x5e9   :  { %3557 = vrcp.f32 %v1461_v29 }
 0x5ec   :  { %v1470_v30 = vpop.xlane.xlu0 %1469  ;;  %v1467_v63 = vpop.xlane.xlu1 %1466 }
 0x5ed   :  { %3559 = vrcp.f32 %v1470_v30 }
 0x5ee   :  { %3561 = vrcp.f32 %v1467_v63 }
 0x5ef   :  { %v3556_v14 = vpop.eup %3555 }
 0x5f0   :  { %v1476_v54 = vpop.xlane.xlu0 %1475  ;;  %v1588_v10 = vmul.f32 %v3556_v14, %v4278_v55 }
 0x5f1   :  { %3563 = vrcp.f32 %v1476_v54 }
 0x5f3   :  { %v3558_v38 = vpop.eup %3557 }
 0x5f4   :  { %v1473_v8 = vpop.xlane.xlu1 %1472  ;;  %v1587_v41 = vmul.f32 %v3558_v38, %v4283_v61 }
 0x5f5   :  { %3565 = vrcp.f32 %v1473_v8 }
 0x5f6   :  { %3282 = vmatprep.mubr.msk.f32.mxu1 %vm589_vm11, %v1587_v41 }
 0x5f7   :  { %v3560_v46 = vpop.eup %3559  ;;  %3283 = vmatmul.mubr.msk.f32.vlgmr.msra.gmra.mrb[36].mxu1 %vm589_vm11, %v1588_v10 }
 0x5f8   :  { %v3562_v28 = vpop.eup %3561  ;;  %v1590_v4 = vmul.f32 %v3560_v46, %v4290_v11  ;;  %v1482_v15 = vpop.xlane.xlu0 %1481 }
 0x5f9   :  { %v1589_v49 = vmul.f32 %v3562_v28, %v4287_v12  ;;  %3567 = vrcp.f32 %v1482_v15 }
 0x5fb   :  { %3285 = vmatprep.mubr.msk.f32.mxu1 %vm589_vm11, %v1589_v49  ;;  %v3564_v50 = vpop.eup %3563 }
 0x5fc   :  { %3286 = vmatmul.mubr.msk.f32.gmra.mrb[38].mxu1 %vm589_vm11, %v1590_v4  ;;  %v1479_v61 = vpop.xlane.xlu1 %1478  ;;  %v1592_v35 = vmul.f32 %v3564_v50, %v4297_v26 }
 0x5fd   :  { %3569 = vrcp.f32 %v1479_v61 }
 0x5ff   :  { %v3566_v55 = vpop.eup %3565 }
 0x600   :  { %v1591_v20 = vmul.f32 %v3566_v55, %v4303_v39  ;;  %v1488_v37 = vpop.xlane.xlu0 %1487 }
 0x601   :  { %3571 = vrcp.f32 %v1488_v37 }
 0x602   :  { %3288 = vmatprep.mubr.msk.f32.mxu1 %vm589_vm11, %v1591_v20 }
 0x603   :  { %3289 = vmatmul.mubr.msk.f32.gmra.mrb[40].mxu1 %vm589_vm11, %v1592_v35  ;;  %v3568_v19 = vpop.eup %3567 }
 0x604   :  { %v1494_v12 = vpop.xlane.xlu0 %1493  ;;  %v1485_v11 = vpop.xlane.xlu1 %1484  ;;  %v1594_v39 = vmul.f32 %v3568_v19, %v4309_v51 }
 0x605   :  { %3573 = vrcp.f32 %v1485_v11 }
 0x606   :  { %3575 = vrcp.f32 %v1494_v12 }
 0x607   :  { %v3570_v59 = vpop.eup %3569 }
 0x608   :  { %v1500_v0 = vpop.xlane.xlu0 %1499  ;;  %v1491_v32 = vpop.xlane.xlu1 %1490  ;;  %v1593_v25 = vmul.f32 %v3570_v59, %v4315_v48 }
 0x609   :  { %3577 = vrcp.f32 %v1491_v32 }
 0x60a   :  { %3291 = vmatprep.mubr.msk.f32.mxu1 %vm589_vm11, %v1593_v25  ;;  %3579 = vrcp.f32 %v1500_v0 }
 0x60b   :  { %3292 = vmatmul.mubr.msk.f32.gmra.mrb[42].mxu1 %vm589_vm11, %v1594_v39  ;;  %v3572_v56 = vpop.eup %3571 }
 0x60c   :  { %v1506_v26 = vpop.xlane.xlu0 %1505  ;;  %v1497_v7 = vpop.xlane.xlu1 %1496  ;;  %v1596_v48 = vmul.f32 %v3572_v56, %v4321_v9 }
 0x60d   :  { %3581 = vrcp.f32 %v1497_v7 }
 0x60e   :  { %3583 = vrcp.f32 %v1506_v26 }
 0x60f   :  { %v3574_v53 = vpop.eup %3573 }
 0x610   :  { %v1512_v43 = vpop.xlane.xlu0 %1511  ;;  %v1503_v58 = vpop.xlane.xlu1 %1502  ;;  %v1595_v22 = vmul.f32 %v3574_v53, %v4329_v23 }
 0x611   :  { %3585 = vrcp.f32 %v1503_v58  ;;  %v3576_v51 = vpop.eup %3575 }
 0x612   :  { %3294 = vmatprep.mubr.msk.f32.mxu1 %vm589_vm11, %v1595_v22  ;;  %3587 = vrcp.f32 %v1512_v43  ;;  %v1598_v14 = vmul.f32 %v3576_v51, %v4327_v3 }
 0x613   :  { %v3578_v29 = vpop.eup %3577  ;;  %3295 = vmatmul.mubr.msk.f32.gmra.mrb[44].mxu1 %vm589_vm11, %v1596_v48 }
 0x614   :  { %v1518_v30 = vpop.xlane.xlu0 %1517  ;;  %v1509_v63 = vpop.xlane.xlu1 %1508  ;;  %v1597_v54 = vmul.f32 %v3578_v29, %v4339_v42 }
 0x615   :  { %3589 = vrcp.f32 %v1509_v63  ;;  %v3580_v38 = vpop.eup %3579 }
 0x616   :  { %3297 = vmatprep.mubr.msk.f32.mxu1 %vm589_vm11, %v1597_v54  ;;  %3591 = vrcp.f32 %v1518_v30  ;;  %v1600_v10 = vmul.f32 %v3580_v38, %v4337_v31  ;;  %v3631_v30 = vld [vmem:[%s4822_s4 + $0x208] sm:$0xff] }
 0x617   :  { %v3582_v23 = vpop.eup %3581  ;;  %3298 = vmatmul.mubr.msk.f32.gmra.mrb[46].mxu1 %vm589_vm11, %v1598_v14 }
 0x618   :  { %v1524_v9 = vpop.xlane.xlu0 %1523  ;;  %v1515_v8 = vpop.xlane.xlu1 %1514  ;;  %v1599_v41 = vmul.f32 %v3582_v23, %v4349_v60  ;;  %v3633_v23 = vld [vmem:[%s4822_s4 + $0x218] sm:$0xff] }
 0x619   :  { %3593 = vrcp.f32 %v1515_v8  ;;  %v3584_v46 = vpop.eup %3583 }
 0x61a   :  { %3300 = vmatprep.mubr.msk.f32.mxu1 %vm589_vm11, %v1599_v41  ;;  %3595 = vrcp.f32 %v1524_v9  ;;  %v1602_v49 = vmul.f32 %v3584_v46, %v4347_v40  ;;  %v3634_v41 = vld [vmem:[%s4822_s4 + $0x210] sm:$0xff] }
 0x61b   :  { %v3586_v42 = vpop.eup %3585  ;;  %3301 = vmatmul.mubr.msk.f32.gmra.mrb[48].mxu1 %vm589_vm11, %v1600_v10 }
 0x61c   :  { %v1530_v3 = vpop.xlane.xlu0 %1529  ;;  %v1521_v28 = vpop.xlane.xlu1 %1520  ;;  %v1601_v4 = vmul.f32 %v3586_v42, %v4359_v1 }
 0x61d   :  { %3597 = vrcp.f32 %v1521_v28  ;;  %v3588_v15 = vpop.eup %3587 }
 0x61e   :  { %3303 = vmatprep.mubr.msk.f32.mxu1 %vm589_vm11, %v1601_v4  ;;  %3599 = vrcp.f32 %v1530_v3  ;;  %v1604_v55 = vmul.f32 %v3588_v15, %v4357_v5  ;;  %v3635_v3 = vld [vmem:[%s4822_s4 + $0x228] sm:$0xff] }
 0x61f   :  { %v3590_v60 = vpop.eup %3589  ;;  %3304 = vmatmul.mubr.msk.f32.gmra.mrb[50].mxu1 %vm589_vm11, %v1602_v49  ;;  %v3636_v49 = vld [vmem:[%s4822_s4 + $0x220] sm:$0xff] }
 0x620   :  { %v1536_v31 = vpop.xlane.xlu0 %1535  ;;  %v1527_v61 = vpop.xlane.xlu1 %1526  ;;  %v1603_v50 = vmul.f32 %v3590_v60, %v4369_v18 }
 0x621   :  { %3601 = vrcp.f32 %v1527_v61  ;;  %v3592_v20 = vpop.eup %3591  ;;  %v3637_v61 = vld [vmem:[%s4822_s4 + $0x238] sm:$0xff] }
 0x622   :  { %3306 = vmatprep.mubr.msk.f32.mxu1 %vm589_vm11, %v1603_v50  ;;  %3603 = vrcp.f32 %v1536_v31  ;;  %v1606_v12 = vmul.f32 %v3592_v20, %v4367_v16  ;;  %v3638_v20 = vld [vmem:[%s4822_s4 + $0x230] sm:$0xff] }
 0x623   :  { %v3594_v1 = vpop.eup %3593  ;;  %3307 = vmatmul.mubr.msk.f32.gmra.mrb[52].mxu1 %vm589_vm11, %v1604_v55 }
 0x624   :  { %v1542_v40 = vpop.xlane.xlu0 %1541  ;;  %v1533_v37 = vpop.xlane.xlu1 %1532  ;;  %v1605_v35 = vmul.f32 %v3594_v1, %v4379_v34 }
 0x625   :  { %3605 = vrcp.f32 %v1533_v37  ;;  %v3596_v11 = vpop.eup %3595 }
 0x626   :  { %3309 = vmatprep.mubr.msk.f32.mxu1 %vm589_vm11, %v1605_v35  ;;  %3607 = vrcp.f32 %v1542_v40  ;;  %v1608_v0 = vmul.f32 %v3596_v11, %v4377_v33  ;;  %v3639_v35 = vld [vmem:[%s4822_s4 + $0x248] sm:$0xff] }
 0x627   :  { %v3598_v18 = vpop.eup %3597  ;;  %3310 = vmatmul.mubr.msk.f32.gmra.mrb[54].mxu1 %vm589_vm11, %v1606_v12 }
 0x628   :  { %v1548_v5 = vpop.xlane.xlu0 %1547  ;;  %v1539_v19 = vpop.xlane.xlu1 %1538  ;;  %v1607_v59 = vmul.f32 %v3598_v18, %v4389_v24  ;;  %v3640_v18 = vld [vmem:[%s4822_s4 + $0x240] sm:$0xff] }
 0x629   :  { %3609 = vrcp.f32 %v1539_v19  ;;  %v3600_v32 = vpop.eup %3599 }
 0x62a   :  { %3312 = vmatprep.mubr.msk.f32.mxu1 %vm589_vm11, %v1607_v59  ;;  %3611 = vrcp.f32 %v1548_v5  ;;  %v1610_v26 = vmul.f32 %v3600_v32, %v4387_v44 }
 0x62b   :  { %v3602_v34 = vpop.eup %3601  ;;  %3313 = vmatmul.mubr.msk.f32.gmra.mrb[56].mxu1 %vm589_vm11, %v1608_v0  ;;  %v3641_v0 = vld [vmem:[%s4822_s4 + $0x258] sm:$0xff] }
 0x62c   :  { %v1545_v16 = vpop.xlane.xlu1 %1544  ;;  %v1554_v25 = vpop.xlane.xlu0 %1553  ;;  %v1609_v39 = vmul.f32 %v3602_v34, %v4398_v57 }
 0x62d   :  { %3613 = vrcp.f32 %v1545_v16  ;;  %v3604_v7 = vpop.eup %3603  ;;  %v3642_v16 = vld [vmem:[%s4822_s4 + $0x250] sm:$0xff] }
 0x62e   :  { %3315 = vmatprep.mubr.msk.f32.mxu1 %vm589_vm11, %v1609_v39  ;;  %3615 = vrcp.f32 %v1554_v25  ;;  %v1612_v53 = vmul.f32 %v3604_v7, %v4396_v52  ;;  %v3643_v7 = vld [vmem:[%s4822_s4 + $0x268] sm:$0xff] }
 0x62f   :  { %v3606_v24 = vpop.eup %3605  ;;  %3316 = vmatmul.mubr.msk.f32.gmra.mrb[58].mxu1 %vm589_vm11, %v1610_v26 }
 0x630   :  { %v1551_v33 = vpop.xlane.xlu1 %1550  ;;  %v1611_v56 = vmul.f32 %v3606_v24, %v4407_v6  ;;  %v3608_v43 = vpop.eup %3607 }
 0x631   :  { %3617 = vrcp.f32 %v1551_v33  ;;  %v1614_v58 = vmul.f32 %v3608_v43, %v4405_v62 }
 0x632   :  { %3318 = vmatprep.mubr.msk.f32.mxu1 %vm589_vm11, %v1611_v56  ;;  %v3644_v56 = vld [vmem:[%s4822_s4 + $0x260] sm:$0xff] }
 0x633   :  { %v3610_v57 = vpop.eup %3609  ;;  %3319 = vmatmul.mubr.msk.f32.gmra.mrb[60].mxu1 %vm589_vm11, %v1612_v53 }
 0x634   :  { %v1613_v44 = vmul.f32 %v3610_v57, %v4415_v47  ;;  %v3612_v22 = vpop.eup %3611 }
 0x635   :  { %v1616_v52 = vmul.f32 %v3612_v22, %v4413_v45  ;;  %v155_v45 = vld [vmem:[%s4823_s5 + $0x8] sm:$0xff] }
 0x636   :  { %3321 = vmatprep.mubr.msk.f32.mxu1 %vm589_vm11, %v1613_v44  ;;  %2039 = vmatprep.mubr.f32.mxu0 %v155_v45  ;;  %v3645_v44 = vld [vmem:[%s4822_s4 + $0x278] sm:$0xff]  ;;  %v3648_v45 = vld [vmem:[%s4822_s4 + $0x280] sm:$0xff] }
 0x637   :  { %v3614_v48 = vpop.eup %3613  ;;  %3322 = vmatmul.mubr.msk.f32.gmra.mrb[62].mxu1 %vm589_vm11, %v1614_v58 }
 0x638   :  { %v1615_v6 = vmul.f32 %v3614_v48, %v4423_v17  ;;  %v3616_v51 = vpop.eup %3615  ;;  %v3646_v48 = vld [vmem:[%s4822_s4 + $0x270] sm:$0xff] }
 0x639   :  { %v1618_v62 = vmul.f32 %v3616_v51, %v4421_v13  ;;  %v3632_v13 = vld [vmem:[%s4822_s4 + $0x200] sm:$0xff] }
 0x63a   :  { %3324 = vmatprep.mubr.msk.f32.mxu1 %vm589_vm11, %v1615_v6 }
 0x63b   :  { %v3618_v29 = vpop.eup %3617  ;;  %3325 = vmatmul.mubr.msk.f32.gmra.mrb[64].mxu1 %vm589_vm11, %v1616_v52 }
 0x63c   :  { %v1617_v47 = vmul.f32 %v3618_v29, %v4429_v21  ;;  %v3647_v29 = vld [vmem:[%s4822_s4 + $0x288] sm:$0xff] }
 0x63e   :  { %3327 = vmatprep.mubr.msk.f32.mxu1 %vm589_vm11, %v1617_v47 }
 0x63f   :  { %3328 = vmatmul.mubr.msk.f32.gmra.mrb[66].mxu1 %vm589_vm11, %v1618_v62 }
 0x640   :  { %3390 = vmatprep.mubr.msk.f32.mxu1 %vm3667_vm6, %v3668_v27 }
 0x6ca   :  { %v3284_v17 = vpop.f32.mrb[36].mxu1 }
 0x6cb   :  { %v4509_v21 = vmul.f32 %v3631_v30, %v3284_v17  ;;  %v1784_v63 = vpop.f32.mrb[37].mxu1 }
 0x6cc   :  { %v4514_v54 = vmul.f32 %v3632_v13, %v1784_v63  ;;  %v3649_v13 = vld [vmem:[%s4822_s4 + $0x298] sm:$0xff] }
 0x6ce   :  { %v3420_v14 = vpack.c.bf16 %v4509_v21, %v4514_v54 }
 0x6cf   :  { %v3287_v38 = vpop.f32.mrb[38].mxu1 }
 0x6d0   :  { %v4521_v9 = vmul.f32 %v3633_v23, %v3287_v38  ;;  %v1794_v8 = vpop.f32.mrb[39].mxu1 }
 0x6d1   :  { %v4526_v10 = vmul.f32 %v3634_v41, %v1794_v8  ;;  %v3650_v8 = vld [vmem:[%s4822_s4 + $0x290] sm:$0xff] }
 0x6d3   :  { %v3424_v46 = vpack.c.bf16 %v4521_v9, %v4526_v10 }
 0x6d6   :  { %v3290_v42 = vpop.f32.mrb[40].mxu1 }
 0x6d7   :  { %v4533_v28 = vmul.f32 %v3635_v3, %v3290_v42  ;;  %v1804_v4 = vpop.f32.mrb[41].mxu1 }
 0x6d8   :  { %v4538_v15 = vmul.f32 %v3636_v49, %v1804_v4  ;;  %v3651_v4 = vld [vmem:[%s4822_s4 + $0x2a8] sm:$0xff] }
 0x6da   :  { %v3428_v60 = vpack.c.bf16 %v4533_v28, %v4538_v15 }
 0x6de   :  { %v3293_v31 = vpop.f32.mrb[42].mxu1 }
 0x6df   :  { %v4545_v50 = vmul.f32 %v3637_v61, %v3293_v31  ;;  %v1814_v55 = vpop.f32.mrb[43].mxu1  ;;  %v3652_v61 = vld [vmem:[%s4822_s4 + $0x2a0] sm:$0xff] }
 0x6e0   :  { %v4550_v1 = vmul.f32 %v3638_v20, %v1814_v55 }
 0x6e2   :  { %v3432_v40 = vpack.c.bf16 %v4545_v50, %v4550_v1 }
 0x6e6   :  { %v3296_v37 = vpop.f32.mrb[44].mxu1 }
 0x6e7   :  { %v4557_v12 = vmul.f32 %v3639_v35, %v3296_v37  ;;  %v1824_v11 = vpop.f32.mrb[45].mxu1  ;;  %v3654_v35 = vld [vmem:[%s4822_s4 + $0x2b0] sm:$0xff] }
 0x6e8   :  { %v4562_v5 = vmul.f32 %v3640_v18, %v1824_v11 }
 0x6ea   :  { %v3436_v19 = vpack.c.bf16 %v4557_v12, %v4562_v5  ;;  %v3299_v59 = vpop.f32.mrb[46].mxu1 }
 0x6eb   :  { %v4569_v32 = vmul.f32 %v3641_v0, %v3299_v59  ;;  %v1834_v34 = vpop.f32.mrb[47].mxu1  ;;  %v3656_v0 = vld [vmem:[%s4822_s4 + $0x2c0] sm:$0xff] }
 0x6ec   :  { %v4574_v25 = vmul.f32 %v3642_v16, %v1834_v34 }
 0x6ee   :  { %v3440_v39 = vpack.c.bf16 %v4569_v32, %v4574_v25  ;;  %v3302_v26 = vpop.f32.mrb[48].mxu1  ;;  %v154_v25 = vld [vmem:[%s4823_s5] sm:$0xff] }
 0x6ef   :  { %v4581_v24 = vmul.f32 %v3643_v7, %v3302_v26  ;;  %v1844_v33 = vpop.f32.mrb[49].mxu1  ;;  %v3658_v7 = vld [vmem:[%s4822_s4 + $0x2d0] sm:$0xff] }
 0x6f0   :  { %v4586_v53 = vmul.f32 %v3644_v56, %v1844_v33 }
 0x6f2   :  { %v3444_v43 = vpack.c.bf16 %v4581_v24, %v4586_v53  ;;  %v3305_v57 = vpop.f32.mrb[50].mxu1  ;;  %v156_v24 = vld [vmem:[%s4823_s5 + $0x10] sm:$0xff]  ;;  %v159_v53 = vld [vmem:[%s4823_s5 + $0x28] sm:$0xff] }
 0x6f3   :  { %v4593_v58 = vmul.f32 %v3645_v44, %v3305_v57  ;;  %v1854_v22 = vpop.f32.mrb[51].mxu1  ;;  %v3660_v44 = vld [vmem:[%s4822_s4 + $0x2e0] sm:$0xff] }
 0x6f4   :  { %v4598_v6 = vmul.f32 %v3646_v48, %v1854_v22 }
 0x6f6   :  { %v3448_v51 = vpack.c.bf16 %v4593_v58, %v4598_v6  ;;  %v3308_v52 = vpop.f32.mrb[52].mxu1  ;;  %v161_v58 = vld [vmem:[%s4823_s5 + $0x38] sm:$0xff]  ;;  %v160_v6 = vld [vmem:[%s4823_s5 + $0x30] sm:$0xff] }
 0x6f7   :  { %v1960_v47 = vmul.f32 %v3647_v29, %v3308_v52  ;;  %v1864_v62 = vpop.f32.mrb[53].mxu1  ;;  %v3662_v29 = vld [vmem:[%s4822_s4 + $0x2f0] sm:$0xff] }
 0x6f8   :  { %v1959_v17 = vmul.f32 %v3648_v45, %v1864_v62  ;;  %v162_v62 = vld [vmem:[%s4823_s5 + $0x40] sm:$0xff]  ;;  %v165_v45 = vld [vmem:[%s4823_s5 + $0x58] sm:$0xff] }
 0x6fa   :  { %v3418_v30 = vpack.c.bf16 %v1960_v47, %v1959_v17  ;;  %v3311_v63 = vpop.f32.mrb[54].mxu1  ;;  %v164_v17 = vld [vmem:[%s4823_s5 + $0x50] sm:$0xff] }
 0x6fb   :  { %v1962_v38 = vmul.f32 %v3649_v13, %v3311_v63  ;;  %v1874_v23 = vpop.f32.mrb[55].mxu1  ;;  %v166_v63 = vld [vmem:[%s4823_s5 + $0x60] sm:$0xff]  ;;  %v169_v13 = vld [vmem:[%s4823_s5 + $0x78] sm:$0xff] }
 0x6fc   :  { %v1961_v41 = vmul.f32 %v3650_v8, %v1874_v23  ;;  %3419 = vmatprep.subr.bf16.mxu0 %v3418_v30  ;;  %v167_v30 = vld [vmem:[%s4823_s5 + $0x68] sm:$0xff] }
 0x6fd   :  { %3421 = vmatpush3.bf16.msra.mxu0 %v3420_v14  ;;  %v3653_v14 = vld [vmem:[%s4822_s4 + $0x2b8] sm:$0xff] }
 0x6fe   :  { %v3422_v42 = vpack.c.bf16 %v1962_v38, %v1961_v41  ;;  %v3314_v3 = vpop.f32.mrb[56].mxu1  ;;  %v168_v38 = vld [vmem:[%s4823_s5 + $0x70] sm:$0xff] }
 0x6ff   :  { %v1964_v49 = vmul.f32 %v3651_v4, %v3314_v3  ;;  %v1884_v31 = vpop.f32.mrb[57].mxu1 }
 0x700   :  { %v1963_v55 = vmul.f32 %v3652_v61, %v1884_v31  ;;  %3423 = vmatprep.subr.bf16.mxu0 %v3422_v42 }
 0x701   :  { %3425 = vmatpush3.bf16.msra.mxu0 %v3424_v46  ;;  %v3655_v46 = vld [vmem:[%s4822_s4 + $0x2c8] sm:$0xff] }
 0x702   :  { %v3426_v21 = vpack.c.bf16 %v1964_v49, %v1963_v55  ;;  %v3317_v54 = vpop.f32.mrb[58].mxu1 }
 0x703   :  { %v1966_v20 = vmul.f32 %v3653_v14, %v3317_v54  ;;  %v1894_v37 = vpop.f32.mrb[59].mxu1 }
 0x704   :  { %v1965_v11 = vmul.f32 %v3654_v35, %v1894_v37  ;;  %3427 = vmatprep.subr.bf16.mxu0 %v3426_v21 }
 0x705   :  { %3429 = vmatpush3.bf16.msra.mxu0 %v3428_v60  ;;  %v3657_v60 = vld [vmem:[%s4822_s4 + $0x2d8] sm:$0xff] }
 0x706   :  { %v3430_v9 = vpack.c.bf16 %v1966_v20, %v1965_v11  ;;  %v3320_v10 = vpop.f32.mrb[60].mxu1 }
 0x707   :  { %v1968_v18 = vmul.f32 %v3655_v46, %v3320_v10  ;;  %v1904_v59 = vpop.f32.mrb[61].mxu1 }
 0x708   :  { %v1967_v34 = vmul.f32 %v3656_v0, %v1904_v59  ;;  %3431 = vmatprep.subr.bf16.mxu0 %v3430_v9 }
 0x709   :  { %3433 = vmatpush3.bf16.msra.mxu0 %v3432_v40  ;;  %v3659_v40 = vld [vmem:[%s4822_s4 + $0x2e8] sm:$0xff] }
 0x70a   :  { %v3434_v28 = vpack.c.bf16 %v1968_v18, %v1967_v34  ;;  %v3323_v15 = vpop.f32.mrb[62].mxu1 }
 0x70b   :  { %v1970_v16 = vmul.f32 %v3657_v60, %v3323_v15  ;;  %v1914_v26 = vpop.f32.mrb[63].mxu1 }
 0x70c   :  { %v1969_v33 = vmul.f32 %v3658_v7, %v1914_v26  ;;  %3435 = vmatprep.subr.bf16.mxu0 %v3434_v28  ;;  %v30_v7 = vld [vmem:[%s4819_s2 + $0x28] sm:$0xff] }
 0x70d   :  { %3437 = vmatpush3.bf16.msra.mxu0 %v3436_v19  ;;  %v3661_v19 = vld [vmem:[%s4822_s4 + $0x2f8] sm:$0xff] }
 0x70e   :  { %v3438_v50 = vpack.c.bf16 %v1970_v16, %v1969_v33  ;;  %v3326_v1 = vpop.f32.mrb[64].mxu1  ;;  %v2260_v33 = vpop.permute.xlu1 %2259 }
 0x70f   :  { %v1972_v56 = vmul.f32 %v3659_v40, %v3326_v1  ;;  %v1924_v57 = vpop.f32.mrb[65].mxu1  ;;  %v2926_v1 = vld [vmem:[%s4820_s3 + $0x90] ss:$0 sm:$0xff]  ;;  %v2262_v40 = vsel %vm174_vm1, 0.0, %v2260_v33 }
 0x710   :  { %v1971_v22 = vmul.f32 %v3660_v44, %v1924_v57  ;;  %3439 = vmatprep.subr.bf16.mxu0 %v3438_v50  ;;  %v38_v50 = vld [vmem:[%s4820_s3 + $0x20] sm:$0xff] }
 0x711   :  { %3441 = vmatpush3.bf16.msra.mxu0 %v3440_v39  ;;  %v157_v39 = vld [vmem:[%s4823_s5 + $0x18] sm:$0xff] }
 0x712   :  { %v3442_v12 = vpack.c.bf16 %v1972_v56, %v1971_v22  ;;  %v3329_v5 = vpop.f32.mrb[66].mxu1  ;;  %v2267_v22 = vmul.f32 %v2926_v1, %v2262_v40  ;;  %v57_v40 = vld [vmem:[%s4820_s3 + $0xa0] sm:$0x3] }
 0x713   :  { %v1974_v48 = vmul.f32 %v3661_v19, %v3329_v5  ;;  %v1934_v52 = vpop.f32.mrb[67].mxu1  ;;  %v31_v5 = vld [vmem:[%s4819_s2 + $0x30] sm:$0xff] }
 0x714   :  { %v1973_v47 = vmul.f32 %v3662_v29, %v1934_v52  ;;  %3443 = vmatprep.subr.bf16.mxu0 %v3442_v12  ;;  %v3470_v19 = vpack.c.bf16 %v3763_v36, %v2267_v22 }
 0x715   :  { %3445 = vmatpush3.bf16.msra.mxu0 %v3444_v43  ;;  %v158_v43 = vld [vmem:[%s4823_s5 + $0x20] sm:$0xff] }
 0x716   :  { %v3446_v32 = vpack.c.bf16 %v1974_v48, %v1973_v47  ;;  %v39_v48 = vld [vmem:[%s4820_s3 + $0x28] sm:$0xff] }
 0x718   :  { %3447 = vmatprep.subr.bf16.mxu0 %v3446_v32 }
 0x719   :  { %3449 = vmatpush3.bf16.msra.mxu0 %v3448_v51  ;;  %v163_v51 = vld [vmem:[%s4823_s5 + $0x48] sm:$0xff] }
 0x71a   :  { %3450 = vmatprep.subr.bf16.mxu0 %v3664_v2 }
 0x71c   :  { %2040 = vmatmul.mubr.f32.vlgmr.msra.gmra.mrb[38].mxu0 %v154_v25 }
 0x71d   :  { %2044 = vmatprep.mubr.f32.mxu0 %v157_v39 }
 0x720   :  { %2045 = vmatmul.mubr.f32.gmra.mrb[40].mxu0 %v156_v24 }
 0x721   :  { %2049 = vmatprep.mubr.f32.mxu0 %v159_v53  ;;  %v2269_v53 = vpop.permute.xlu0 %2268 }
 0x724   :  { %2050 = vmatmul.mubr.f32.gmra.mrb[42].mxu0 %v158_v43  ;;  %v2927_v43 = vld [vmem:[%s4820_s3 + $0x91] ss:$0 sm:$0xff] }
 0x725   :  { %2054 = vmatprep.mubr.f32.mxu0 %v161_v58  ;;  %v2272_v58 = vsel %vm2271_vm14, %v2269_v53, 0.0 }
 0x728   :  { %2055 = vmatmul.mubr.f32.gmra.mrb[44].mxu0 %v160_v6 }
 0x729   :  { %2059 = vmatprep.mubr.f32.mxu0 %v163_v51 }
 0x72c   :  { %2060 = vmatmul.mubr.f32.gmra.mrb[46].mxu0 %v162_v62  ;;  %v2277_v62 = vmul.f32 %v2927_v43, %v2272_v58 }
 0x72d   :  { %2064 = vmatprep.mubr.f32.mxu0 %v165_v45 }
 0x730   :  { %2065 = vmatmul.mubr.f32.gmra.mrb[48].mxu0 %v164_v17 }
 0x731   :  { %2069 = vmatprep.mubr.f32.mxu0 %v167_v30 }
 0x734   :  { %2070 = vmatmul.mubr.f32.gmra.mrb[50].mxu0 %v166_v63 }
 0x735   :  { %2074 = vmatprep.mubr.f32.mxu0 %v169_v13 }
 0x738   :  { %2075 = vmatmul.mubr.f32.gmra.mrb[52].mxu0 %v168_v38 }
 0x739   :  { %3346 = vmatprep.mubr.msk.f32.mxu0 %vm3667_vm6, %v3668_v27 }
 0x7ef   :  { %v3086_v23 = vpop.f32.mrb[38].mxu0 }
 0x7f0   :  { %v3087_v8 = vpop.f32.mrb[39].mxu0 }
 0x7f1   :  { %v3088_v41 = vadd.f32 %v3087_v8, %v3086_v23  ;;  %v32_v23 = vld [vmem:[%s4819_s2 + $0x38] sm:$0xff]  ;;  %v40_v8 = vld [vmem:[%s4820_s3 + $0x30] sm:$0xff] }
 0x7f3   :  { %v3089_v42 = vpop.f32.mrb[40].mxu0 }
 0x7f4   :  { %v3090_v3 = vpop.f32.mrb[41].mxu0 }
 0x7f5   :  { %v3091_v4 = vadd.f32 %v3090_v3, %v3089_v42 }
 0x7f7   :  { %v3451_v31 = vpack.c.bf16 %v3091_v4, %v3088_v41  ;;  %v3092_v61 = vpop.f32.mrb[42].mxu0 }
 0x7f8   :  { %v3093_v55 = vpop.f32.mrb[43].mxu0 }
 0x7f9   :  { %v3094_v21 = vadd.f32 %v3093_v55, %v3092_v61  ;;  %3453 = vmatpush3.bf16.xpose.msk.msra.mxu0 %vm4724_vm12, %v3451_v31 }
 0x7fa   :  { %3454 = vmatprep.subr.bf16.mxu0 %v3664_v2 }
 0x7fb   :  { %v3095_v54 = vpop.f32.mrb[44].mxu0 }
 0x7fc   :  { %v3096_v14 = vpop.f32.mrb[45].mxu0 }
 0x7fd   :  { %v3097_v20 = vadd.f32 %v3096_v14, %v3095_v54 }
 0x7ff   :  { %v3455_v37 = vpack.c.bf16 %v3097_v20, %v3094_v21  ;;  %v3098_v35 = vpop.f32.mrb[46].mxu0 }
 0x800   :  { %v3099_v11 = vpop.f32.mrb[47].mxu0 }
 0x801   :  { %v3100_v9 = vadd.f32 %v3099_v11, %v3098_v35  ;;  %3457 = vmatpush3.bf16.xpose.msk.msra.mxu0 %vm4724_vm12, %v3455_v37 }
 0x802   :  { %3458 = vmatprep.subr.bf16.mxu0 %v3664_v2 }
 0x803   :  { %v3101_v10 = vpop.f32.mrb[48].mxu0 }
 0x804   :  { %v3102_v46 = vpop.f32.mrb[49].mxu0 }
 0x805   :  { %v3103_v18 = vadd.f32 %v3102_v46, %v3101_v10 }
 0x807   :  { %v3459_v59 = vpack.c.bf16 %v3103_v18, %v3100_v9  ;;  %v3104_v0 = vpop.f32.mrb[50].mxu0 }
 0x808   :  { %v3105_v34 = vpop.f32.mrb[51].mxu0 }
 0x809   :  { %v3106_v28 = vadd.f32 %v3105_v34, %v3104_v0  ;;  %3461 = vmatpush3.bf16.xpose.msk.msra.mxu0 %vm4724_vm12, %v3459_v59 }
 0x80a   :  { %3462 = vmatprep.subr.bf16.mxu0 %v3664_v2 }
 0x80b   :  { %v3107_v15 = vpop.f32.mrb[52].mxu0 }
 0x80c   :  { %v3108_v60 = vpop.f32.mrb[53].mxu0 }
 0x80d   :  { %v3109_v16 = vadd.f32 %v3108_v60, %v3107_v15  ;;  %v3669_v15 = vmov -1.0  }
 0x80f   :  { %v3463_v26 = vpack.c.bf16 %v3109_v16, %v3106_v28 }
 0x811   :  { %3465 = vmatpush3.bf16.xpose.msk.msra.mxu0 %vm4724_vm12, %v3463_v26 }
 0x812   :  { %3466 = vmatprep.subr.bf16.mxu0 %v3664_v2 }
 0x818   :  { %3347 = vmatmul.mubr.msk.f32.vlgmr.msra.gmra.mrb[54].mxu0 %vm429_vm8, %v30_v7 }
 0x819   :  { %3353 = vmatprep.mubr.msk.f32.mxu0 %vm3667_vm6, %v3668_v27 }
 0x8eb   :  { %v2173_v56 = vpop.f32.mrb[54].mxu0 }
 0x8ec   :  { %v2174_v57 = vadd.f32 %v2173_v56, %v38_v50  ;;  %v3348_v44 = vpop.f32.mrb[55].mxu0  ;;  %v56_v56 = vld [vmem:[%s4820_s3 + $0x98] sm:$0x3] }
 0x8ee   :  { %v3467_v12 = vpack.c.bf16 %v2174_v57, %v3763_v36 }
 0x8f0   :  { %3468 = vmatpush3.bf16.msra.mxu0 %v3467_v12 }
 0x8f1   :  { %3469 = vmatprep.subr.bf16.mxu0 %v3664_v2 }
 0x8f3   :  { %3354 = vmatmul.mubr.msk.f32.vlgmr.msra.gmra.mrb[56].mxu0 %vm2177_vm13, %v31_v5 }
 0x8f4   :  { %3471 = vmatpush3.bf16.msra.mxu0 %v3470_v19  ;;  %3368 = vmatprep.mubr.msk.f32.mxu0 %vm3667_vm6, %v3668_v27 }
 0x8f5   :  { %3472 = vmatprep.subr.bf16.mxu0 %v3664_v2 }
 0x9c6   :  { %v2247_v52 = vpop.f32.mrb[56].mxu0 }
 0x9c7   :  { %v2248_v29 = vadd.f32 %v2247_v52, %v39_v48  ;;  %v3355_v47 = vpop.f32.mrb[57].mxu0 }
 0x9c9   :  { %v2925_v32 = vmul.f32 -1.442695, %v2248_v29 }
 0x9cb   :  { %3619 = vpow2.f32 %v2925_v32 }
 0x9d5   :  { %v3620_v25 = vpop.eup %3619 }
 0x9d6   :  { %v2254_v39 = vadd.f32 1.0, %v3620_v25  ;;  %v2626_v25 = vlaneseq }
 0x9d8   :  { %3621 = vrcp.f32 %v2254_v39  ;;  %v2627_v39 = vshrl.u32 %v2626_v25, 7 }
 0x9e2   :  { %v3622_v36 = vpop.eup %3621 }
 0x9e3   :  { %v2257_v24 = vmul.f32 %v3622_v36, %v2174_v57  ;;  %v2628_v36 = vsub.s32 0, %v2627_v39 }
 0x9e5   :  { %2279 = vrot.lane.b32.xlu1 %v2257_v24, %s3663_s23 }
 0x9e9   :  { %2284 = vrot.lane.b32.xlu1 %v2257_v24, %s3665_s9 }
 0xa57   :  { %v2280_v6 = vpop.permute.xlu1 %2279 }
 0xa58   :  { %v2282_v51 = vsel %vm174_vm1, 0.0, %v2280_v6  ;;  %vm2553_vm1 = vcmask 1041408  }
 0xa59   :  { %v2283_v45 = vmul.f32 %v2926_v1, %v2282_v51 }
 0xa5b   :  { %v3473_v17 = vpack.c.bf16 %v2283_v45, %v2277_v62  ;;  %v2285_v30 = vpop.permute.xlu1 %2284  ;;  %v33_v62 = vld [vmem:[%s4819_s2 + $0x40] sm:$0xff] }
 0xa5c   :  { %v2287_v63 = vsel %vm2271_vm14, %v2285_v30, 0.0 }
 0xa5d   :  { %v2288_v13 = vmul.f32 %v2927_v43, %v2287_v63  ;;  %3474 = vmatpush3.bf16.msra.mxu0 %v3473_v17 }
 0xa5e   :  { %3475 = vmatprep.subr.bf16.mxu0 %v3664_v2 }
 0xa5f   :  { %v3476_v38 = vpack.c.bf16 %v2288_v13, %v2257_v24 }
 0xa61   :  { %3477 = vmatpush3.bf16.msra.mxu0 %v3476_v38 }
 0xa62   :  { %3478 = vmatprep.subr.bf16.mxu0 %v3664_v2 }
 0xa64   :  { %3369 = vmatmul.mubr.msk.f32.vlgmr.msra.gmra.mrb[58].mxu0 %vm2289_vm15, %v32_v23 }
 0xa65   :  { %3375 = vmatprep.mubr.msk.f32.mxu0 %vm3667_vm6, %v3668_v27 }
 0xb37   :  { %v2359_v41 = vpop.f32.mrb[58].mxu0 }
 0xb38   :  { %v2360_v42 = vadd.f32 %v2359_v41, %v40_v8  ;;  %v3370_v3 = vpop.f32.mrb[59].mxu0 }
 0xb3a   :  { %v2364_v4 = vmul.f32 0.70710677, %v2360_v42  ;;  %v2363_v26 = vmul.f32 0.5, %v2360_v42 }
 0xb3c   :  { %v2367_v49 = vand.u32 2147483647, %v2364_v4  ;;  %vm2365_vm0 = vcmp.ge.f32.partialorder %v2364_v4, 0.0 }
 0xb3d   :  { %v2366_v60 = vsel %vm2365_vm0, 1.0, %v3669_v15 }
 0xb3e   :  { %v2368_v31 = vmul.f32 0.3275911, %v2367_v49  ;;  %v2380_v55 = vsub.f32 0.0, %v2367_v49 }
 0xb40   :  { %v2369_v61 = vadd.f32 1.0, %v2368_v31  ;;  %v2381_v54 = vmul.f32 %v2380_v55, %v2367_v49 }
 0xb42   :  { %3623 = vrcp.f32 %v2369_v61  ;;  %v2382_v37 = vmul.f32 1.442695, %v2381_v54 }
 0xb44   :  { %3625 = vpow2.f32 %v2382_v37 }
 0xb4c   :  { %v3624_v21 = vpop.eup %3623 }
 0xb4d   :  { %v2371_v14 = vmul.f32 1.0614054, %v3624_v21 }
 0xb4e   :  { %v3626_v0 = vpop.eup %3625 }
 0xb4f   :  { %v2372_v20 = vadd.f32 -1.4531521, %v2371_v14  ;;  %v43_v14 = vld [vmem:[%s4820_s3 + $0x48] sm:$0xff] }
 0xb51   :  { %v2373_v35 = vmul.f32 %v3624_v21, %v2372_v20 }
 0xb53   :  { %v2374_v11 = vadd.f32 1.4214138, %v2373_v35 }
 0xb55   :  { %v2375_v9 = vmul.f32 %v3624_v21, %v2374_v11 }
 0xb57   :  { %v2376_v10 = vadd.f32 -0.28449672, %v2375_v9 }
 0xb59   :  { %v2377_v46 = vmul.f32 %v3624_v21, %v2376_v10 }
 0xb5b   :  { %v2378_v18 = vadd.f32 0.2548296, %v2377_v46 }
 0xb5d   :  { %v2379_v59 = vmul.f32 %v3624_v21, %v2378_v18  ;;  %v42_v21 = vld [vmem:[%s4820_s3 + $0x40] sm:$0xff] }
 0xb5f   :  { %v2384_v34 = vmul.f32 %v3626_v0, %v2379_v59 }
 0xb61   :  { %v2385_v28 = vsub.f32 1.0, %v2384_v34 }
 0xb63   :  { %v2386_v16 = vmul.f32 %v2385_v28, %v2366_v60 }
 0xb65   :  { %v2387_v7 = vadd.f32 1.0, %v2386_v16 }
 0xb67   :  { %v2388_v33 = vmul.f32 %v2387_v7, %v2363_v26 }
 0xb69   :  { %v2389_v50 = vmul.f32 %v2388_v33, %v2388_v33 }
 0xb6b   :  { %v3479_v1 = vpack.c.bf16 %v2389_v50, %v2388_v33 }
 0xb6d   :  { %3480 = vmatpush3.bf16.msra.mxu0 %v3479_v1 }
 0xb6e   :  { %3378 = vmatprep.subr.mxu0 %v3668_v27 }
 0xb70   :  { %3376 = vmatmul.mubr.msk.f32.vlgmr.msra.gmra.mrb[60].mxu0 %vm2177_vm13, %v57_v40 }
 0xb71   :  { %3380 = vmatprep.mubr.msk.f32.mxu0 %vm3667_vm6, %v3668_v27 }
 0xb76   :  { %3379 = vmatpush3.xpose.msk.msra.mxu0 %vm589_vm11, %v56_v56 }
 0xb77   :  { %3383 = vmatprep.subr.mxu0 %v3668_v27 }
 0xc43   :  { %v2459_v57 = vpop.f32.mrb[60].mxu0 }
 0xc44   :  { %v3377_v44 = vpop.f32.mrb[61].mxu0  ;;  %3381 = vmatmul.mubr.msk.f32.vlgmr.msra.gmra.mrb[62].mxu0 %vm589_vm11, %v2459_v57 }
 0xc45   :  { %3385 = vmatprep.mubr.msk.f32.mxu0 %vm3667_vm6, %v3668_v27  ;;  %3384 = vmatpush3.msk.msra.mxu0 %vm2553_vm1, %v56_v56 }
 0xc46   :  { %3481 = vmatprep.subr.bf16.mxu0 %v3664_v2  ;;  %v2633_v2 = vsub.s32 1, %v2627_v39 }
 0xd17   :  { %v2535_v22 = vpop.f32.mrb[62].mxu0 }
 0xd18   :  { %v2539_v12 = vmul.f32 0.00390625, %v2535_v22  ;;  %v3382_v5 = vpop.f32.mrb[63].mxu0 }
 0xd1a   :  { %v2540_v19 = vmul.f32 %v2539_v12, %v2539_v12 }
 0xd1c   :  { %v2542_v48 = vrot.slane %v2540_v19, 7 }
 0xd1e   :  { %v2544_v52 = vsub.f32 %v2539_v12, %v2542_v48 }
 0xd20   :  { %v2545_v29 = vadd.f32 1e-05, %v2544_v52 }
 0xd22   :  { %3627 = vrsqrt.f32 %v2545_v29 }
 0xd2c   :  { %v3628_v47 = vpop.eup %3627 }
 0xd2d   :  { %v2548_v32 = vsel %vm2547_vm2, %v2539_v12, %v3628_v47 }
 0xd2e   :  { %3386 = vmatmul.mubr.msk.f32.vlgmr.msra.gmra.mrb[64].mxu0 %vm2549_vm3, %v2548_v32 }
 0xd2f   :  { %3397 = vmatprep.mubr.msk.f32.mxu0 %vm3667_vm6, %v3668_v27  ;;  %v41_v27 = vld [vmem:[%s4820_s3 + $0x38] sm:$0xff] }
 0xe01   :  { %v2622_v24 = vpop.f32.mrb[64].mxu0 }
 0xe02   :  { %v2629_v53 = vrot.slane %v2622_v24, %v2628_v36  ;;  %v3387_v43 = vpop.f32.mrb[65].mxu0  ;;  %v2634_v6 = vrot.slane %v2622_v24, %v2633_v2 }
 0xe04   :  { %v2630_v58 = vsub.f32 %v2388_v33, %v2629_v53 }
 0xe06   :  { %v2635_v51 = vmul.f32 %v2634_v6, %v2630_v58 }
 0xe08   :  { %3389 = vmatpush3.msra.mxu1 %v2635_v51 }
 0xe09   :  { %3391 = vmatmul.mubr.msk.f32.vlgmr.msra.gmra.mrb[68].mxu1 %vm429_vm8, %v33_v62 }
 0xedc   :  { %v2705_v45 = vpop.f32.mrb[68].mxu1 }
 0xedd   :  { %v2706_v17 = vadd.f32 %v2705_v45, %v41_v27  ;;  %v3392_v30 = vpop.f32.mrb[69].mxu1 }
 0xedf   :  { %v2709_v63 = vmul.f32 %v2706_v17, %v2706_v17 }
 0xee1   :  { %v3482_v13 = vpack.c.bf16 %v2709_v63, %v2706_v17 }
 0xee3   :  { %3483 = vmatpush3.bf16.msra.mxu0 %v3482_v13 }
 0xee6   :  { %3398 = vmatmul.mubr.msk.f32.vlgmr.msra.gmra.mrb[66].mxu0 %vm2177_vm13, %v57_v40 }
 0xfb9   :  { %v2776_v38 = vpop.f32.mrb[66].mxu0 }
 0xfba   :  { %v2780_v23 = vmul.f32 0.125, %v2776_v38  ;;  %v3399_v8 = vpop.f32.mrb[67].mxu0 }
 0xfbc   :  { %v2781_v41 = vmul.f32 %v2780_v23, %v2780_v23  ;;  %v2789_v49 = vrot.slane %v2780_v23, %v2628_v36 }
 0xfbe   :  { %v2783_v42 = vrot.slane %v2781_v41, 7  ;;  %v2790_v61 = vsub.f32 %v2706_v17, %v2789_v49 }
 0xfc0   :  { %v2785_v3 = vsub.f32 %v2780_v23, %v2783_v42 }
 0xfc2   :  { %v2791_v4 = vadd.f32 1e-05, %v2785_v3 }
 0xfc4   :  { %3629 = vrsqrt.f32 %v2791_v4 }
 0xfce   :  { %v3630_v31 = vpop.eup %3629 }
 0xfcf   :  { %v2796_v55 = vrot.slane %v3630_v31, %v2633_v2 }
 0xfd1   :  { %v2797_v54 = vmul.f32 %v2796_v55, %v2790_v61 }
 0xfd3   :  { %v2798_v20 = vmul.f32 %v2797_v54, %v42_v21 }
 0xfd5   :  { %v2799_v37 = vadd.f32 %v2798_v20, %v43_v14 }
 0xfd7   :  { %v2800_v35 = vsel %vm589_vm11, %v2799_v37, 0.0 }
 0xfd8   :  { %2801 = vst [vmem:[%s4824_s6] sm:$0xff] %v2800_v35 }

</bundles_post_ra>
